<compile_context>
chip_gen: v5e
topology: v5e:2x2
jax: 0.10.0
libtpu: 0.0.40
codegen_flags: <defaults>
</compile_context>

<pallas_src>
import functools
import math

import jax
import jax.numpy as jnp
from jax.experimental import pallas as pl
from jax.experimental.pallas import tpu as pltpu


# ----------------------------- helpers -----------------------------

def _layernorm(x, g, b, eps=1e-5):
    mu = jnp.mean(x, axis=-1, keepdims=True)
    var = jnp.mean((x - mu) ** 2, axis=-1, keepdims=True)
    return (x - mu) * jax.lax.rsqrt(var + eps) * g + b


def _gelu_exact(x):
    # Matches torch.nn.GELU() (erf form).
    return 0.5 * x * (1.0 + jax.lax.erf(x / math.sqrt(2.0)))


# ----------------------------- kernel bodies -----------------------------

def decoder_kernel(nhead,
                   x_ref,
                   g1_ref, b1_ref,
                   wq_ref, bq_ref, wk_ref, bk_ref, wv_ref, bv_ref,
                   wo_ref, bo_ref,
                   g2_ref, b2_ref,
                   wf1_ref, bf1_ref, wf2_ref, bf2_ref,
                   o_ref,
                   x_vmem):
    """All transformer blocks for one batch element.

    grid = (B, num_layers); the layer axis is 'arbitrary' and the activation
    (L, D) stays resident in `x_vmem` across layers.  Weights are host-side
    pre-transposed and streamed per layer via their index_map.
    """
    layer = pl.program_id(1)
    n_layers = pl.num_programs(1)

    @pl.when(layer == 0)
    def _():
        x_vmem[...] = x_ref[0]

    x = x_vmem[...]                            # (L, D)
    L, D = x.shape
    hd = D // nhead
    scale = 1.0 / math.sqrt(hd)

    # ---- ln_1 + multi-head self-attention ----
    a = _layernorm(x, g1_ref[0, 0], b1_ref[0, 0])
    q = jnp.dot(a, wq_ref[0], preferred_element_type=jnp.float32) + bq_ref[0, 0]
    k = jnp.dot(a, wk_ref[0], preferred_element_type=jnp.float32) + bk_ref[0, 0]
    v = jnp.dot(a, wv_ref[0], preferred_element_type=jnp.float32) + bv_ref[0, 0]

    # Batch heads into (H, L, hd): one einsum for scores, one for PV.
    q3 = jnp.stack([q[:, h * hd:(h + 1) * hd] for h in range(nhead)], axis=0)
    k3 = jnp.stack([k[:, h * hd:(h + 1) * hd] for h in range(nhead)], axis=0)
    v3 = jnp.stack([v[:, h * hd:(h + 1) * hd] for h in range(nhead)], axis=0)

    s = jnp.einsum("hqd,hkd->hqk", q3, k3,
                   preferred_element_type=jnp.float32) * scale

    # Causal mask generated in-kernel (no (L, L) HBM operand).
    rows = jax.lax.broadcasted_iota(jnp.int32, (L, L), 0)
    cols = jax.lax.broadcasted_iota(jnp.int32, (L, L), 1)
    s = jnp.where((cols > rows)[None, :, :], -jnp.inf, s)

    s = s - jnp.max(s, axis=-1, keepdims=True)
    p = jnp.exp(s)
    p = p * pl.reciprocal(jnp.sum(p, axis=-1, keepdims=True), approx=True)

    attn3 = jnp.einsum("hqk,hkd->hqd", p, v3,
                       preferred_element_type=jnp.float32)    # (H, L, hd)
    attn = jnp.concatenate([attn3[h] for h in range(nhead)], axis=-1)  # (L, D)
    attn = jnp.dot(attn, wo_ref[0],
                   preferred_element_type=jnp.float32) + bo_ref[0, 0]

    x = x + attn                               # residual (dropout = identity)

    # ---- ln_2 + MLP ----
    m = _layernorm(x, g2_ref[0, 0], b2_ref[0, 0])
    h1 = jnp.dot(m, wf1_ref[0], preferred_element_type=jnp.float32) + bf1_ref[0, 0]
    h1 = _gelu_exact(h1)
    h2 = jnp.dot(h1, wf2_ref[0], preferred_element_type=jnp.float32) + bf2_ref[0, 0]

    x = x + h2
    x_vmem[...] = x

    @pl.when(layer == n_layers - 1)
    def _():
        o_ref[0] = x


def lm_head_kernel(x_ref, g_ref, b_ref, wemb_ref, o_ref):
    """Final LayerNorm + tied lm_head on a (row_tile, vocab_tile) block."""
    xn = _layernorm(x_ref[...], g_ref[0], b_ref[0])
    o_ref[...] = jnp.dot(xn, wemb_ref[...], preferred_element_type=jnp.float32)


# ----------------------------- pallas wrappers -----------------------------

_WEIGHT_ORDER = ("ln1_g", "ln1_b",
                 "wq", "bq", "wk", "bk", "wv", "bv",
                 "wout", "bout",
                 "ln2_g", "ln2_b",
                 "wfc1", "bfc1", "wfc2", "bfc2")


def run_decoder(x, stacked, nhead):
    """Run every transformer block in one fused pallas_call."""
    B, L, D = x.shape
    n_layers = stacked["ln1_g"].shape[0]
    ins = [x] + [stacked[n] for n in _WEIGHT_ORDER]

    in_specs = [pl.BlockSpec((1, L, D), lambda b, l: (b, 0, 0))]
    for arr in ins[1:]:
        in_specs.append(
            pl.BlockSpec((1,) + arr.shape[1:], lambda b, l: (l, 0, 0)))

    return pl.pallas_call(
        functools.partial(decoder_kernel, nhead),
        out_shape=jax.ShapeDtypeStruct((B, L, D), jnp.float32),
        grid=(B, n_layers),
        in_specs=in_specs,
        out_specs=pl.BlockSpec((1, L, D), lambda b, l: (b, 0, 0)),
        scratch_shapes=[pltpu.VMEM((L, D), jnp.float32)],
        compiler_params=pltpu.CompilerParams(
            dimension_semantics=("parallel", "arbitrary")),
    )(*ins)


def _pick_tile(n, candidates):
    for c in candidates:
        if c <= n and n % c == 0:
            return c
    return n


def run_lm_head(x2d, lnf_g, lnf_b, wemb_t):
    """Final LN + tied lm_head, tiled over (rows of B*L, vocab)."""
    R, D = x2d.shape
    nvoc = wemb_t.shape[1]
    row_tile = _pick_tile(R, (512, 256, 128, 64, 32, 16, 8))
    voc_tile = _pick_tile(nvoc, (512, 256, 128))
    grid = (R // row_tile, nvoc // voc_tile)
    return pl.pallas_call(
        lm_head_kernel,
        out_shape=jax.ShapeDtypeStruct((R, nvoc), jnp.float32),
        grid=grid,
        in_specs=[pl.BlockSpec((row_tile, D), lambda r, v: (r, 0)),
                  pl.BlockSpec((1, D), lambda r, v: (0, 0)),
                  pl.BlockSpec((1, D), lambda r, v: (0, 0)),
                  pl.BlockSpec((D, voc_tile), lambda r, v: (0, v))],
        out_specs=pl.BlockSpec((row_tile, voc_tile), lambda r, v: (r, v)),
        compiler_params=pltpu.CompilerParams(
            dimension_semantics=("parallel", "parallel")),
    )(x2d, lnf_g, lnf_b, wemb_t)


# ----------------------------- model setup -----------------------------

def xavier_uniform(key, shape):
    fan_out, fan_in = shape
    bound = math.sqrt(6.0 / (fan_in + fan_out))
    return jax.random.uniform(key, shape, jnp.float32, -bound, bound)


def init_params(key, nvoc, dim, nhead, num_layers, max_len):
    keys = jax.random.split(key, 2 + num_layers)
    tok_emb = xavier_uniform(keys[0], (nvoc, dim))
    pos_emb = xavier_uniform(keys[1], (max_len, dim))

    per = {name: [] for name in _WEIGHT_ORDER}
    for i in range(num_layers):
        bk = jax.random.split(keys[2 + i], 8)
        w_in = xavier_uniform(bk[0], (3 * dim, dim))        # in_proj_weight
        per["ln1_g"].append(jnp.ones((1, dim), jnp.float32))
        per["ln1_b"].append(jnp.zeros((1, dim), jnp.float32))
        # host-side pre-transpose: kernel computes x @ W (no in-kernel .T)
        per["wq"].append(w_in[0 * dim:1 * dim].T)            # (D, D)
        per["wk"].append(w_in[1 * dim:2 * dim].T)            # (D, D)
        per["wv"].append(w_in[2 * dim:3 * dim].T)            # (D, D)
        per["bq"].append(0.02 * jax.random.normal(bk[4], (1, dim)))
        per["bk"].append(0.02 * jax.random.normal(bk[5], (1, dim)))
        per["bv"].append(0.02 * jax.random.normal(bk[6], (1, dim)))
        per["wout"].append(xavier_uniform(bk[1], (dim, dim)).T)        # (D, D)
        per["bout"].append(0.02 * jax.random.normal(bk[7], (1, dim)))
        per["ln2_g"].append(jnp.ones((1, dim), jnp.float32))
        per["ln2_b"].append(jnp.zeros((1, dim), jnp.float32))
        per["wfc1"].append(xavier_uniform(bk[2], (4 * dim, dim)).T)    # (D, 4D)
        per["bfc1"].append(jnp.zeros((1, 4 * dim), jnp.float32))
        per["wfc2"].append(xavier_uniform(bk[3], (dim, 4 * dim)).T)    # (4D, D)
        per["bfc2"].append(jnp.zeros((1, dim), jnp.float32))

    stacked = {name: jnp.stack(vals, axis=0) for name, vals in per.items()}
    return {
        "tok_emb": tok_emb,                 # (nvoc, D) for the gather
        "wemb_t": tok_emb.T,                # (D, nvoc) tied lm_head, pre-T
        "pos_emb": pos_emb,
        "lnf_g": jnp.ones((1, dim), jnp.float32),
        "lnf_b": jnp.zeros((1, dim), jnp.float32),
        "stacked": stacked,
    }


def chatbot_forward(idx, params, nhead):
    B, L = idx.shape
    # Embedding gather + positional embedding (glue, plain JAX).
    x = params["tok_emb"][idx] + params["pos_emb"][:L][None, :, :]
    x = run_decoder(x, params["stacked"], nhead)
    x2d = x.reshape(B * L, -1)
    logits2d = run_lm_head(x2d, params["lnf_g"], params["lnf_b"],
                           params["wemb_t"])
    return logits2d.reshape(B, L, -1)


# ----------------------------- pure-JAX reference -----------------------------

def _ref_forward(idx, params, nhead):
    B, L = idx.shape
    x = params["tok_emb"][idx] + params["pos_emb"][:L][None, :, :]
    D = x.shape[-1]
    hd = D // nhead
    st = params["stacked"]
    n_layers = st["ln1_g"].shape[0]
    mask = jnp.where(jnp.arange(L)[None, :] > jnp.arange(L)[:, None],
                     -jnp.inf, 0.0).astype(jnp.float32)
    for l in range(n_layers):
        a = _layernorm(x, st["ln1_g"][l, 0], st["ln1_b"][l, 0])
        q = a @ st["wq"][l] + st["bq"][l, 0]
        k = a @ st["wk"][l] + st["bk"][l, 0]
        v = a @ st["wv"][l] + st["bv"][l, 0]
        q = q.reshape(B, L, nhead, hd)
        k = k.reshape(B, L, nhead, hd)
        v = v.reshape(B, L, nhead, hd)
        s = jnp.einsum("bqhd,bkhd->bhqk", q, k) / math.sqrt(hd) + mask
        p = jax.nn.softmax(s, axis=-1)
        attn = jnp.einsum("bhqk,bkhd->bqhd", p, v).reshape(B, L, D)
        attn = attn @ st["wout"][l] + st["bout"][l, 0]
        x = x + attn
        m = _layernorm(x, st["ln2_g"][l, 0], st["ln2_b"][l, 0])
        h1 = _gelu_exact(m @ st["wfc1"][l] + st["bfc1"][l, 0])
        x = x + h1 @ st["wfc2"][l] + st["bfc2"][l, 0]
    xn = _layernorm(x, params["lnf_g"][0], params["lnf_b"][0])
    return xn @ params["wemb_t"]


# ----------------------------- main -----------------------------

if __name__ == "__main__":
    B, L = 2, 8
    nvoc, dim, nhead, num_layers, max_len = 64, 32, 4, 2, 16

    key = jax.random.PRNGKey(0)
    k_idx, k_par = jax.random.split(key)
    idx = jax.random.randint(k_idx, (B, L), 0, nvoc, dtype=jnp.int32)
    params = init_params(k_par, nvoc, dim, nhead, num_layers, max_len)

    logits = chatbot_forward(idx, params, nhead)
    logits = jax.block_until_ready(logits)

    assert logits.shape == (B, L, nvoc), logits.shape
    ref = _ref_forward(idx, params, nhead)
    max_err = float(jnp.max(jnp.abs(logits - ref)))
    # Tolerance covers the EUP approximate-reciprocal softmax normalization.
    assert jnp.allclose(logits, ref, rtol=5e-3, atol=5e-3), max_err

    print("KERNEL_OK")
</pallas_src>

<mosaic_0001>
module attributes {stable_mosaic.version = 11 : i64} {
  func.func @decoder_kernel(%arg0: i32, %arg1: i32, %arg2: memref<1x8x32xf32, #tpu.memory_space<vmem>>, %arg3: memref<1x1x32xf32, #tpu.memory_space<vmem>>, %arg4: memref<1x1x32xf32, #tpu.memory_space<vmem>>, %arg5: memref<1x32x32xf32, #tpu.memory_space<vmem>>, %arg6: memref<1x1x32xf32, #tpu.memory_space<vmem>>, %arg7: memref<1x32x32xf32, #tpu.memory_space<vmem>>, %arg8: memref<1x1x32xf32, #tpu.memory_space<vmem>>, %arg9: memref<1x32x32xf32, #tpu.memory_space<vmem>>, %arg10: memref<1x1x32xf32, #tpu.memory_space<vmem>>, %arg11: memref<1x32x32xf32, #tpu.memory_space<vmem>>, %arg12: memref<1x1x32xf32, #tpu.memory_space<vmem>>, %arg13: memref<1x1x32xf32, #tpu.memory_space<vmem>>, %arg14: memref<1x1x32xf32, #tpu.memory_space<vmem>>, %arg15: memref<1x32x128xf32, #tpu.memory_space<vmem>>, %arg16: memref<1x1x128xf32, #tpu.memory_space<vmem>>, %arg17: memref<1x128x32xf32, #tpu.memory_space<vmem>>, %arg18: memref<1x1x32xf32, #tpu.memory_space<vmem>>, %arg19: memref<1x8x32xf32, #tpu.memory_space<vmem>>, %arg20: memref<8x32xf32, #tpu.memory_space<vmem>>) attributes {dimension_semantics = [#tpu.dimension_semantics<parallel>, #tpu.dimension_semantics<arbitrary>], iteration_bounds = array<i64: 2, 2>, scalar_prefetch = 0 : i64, scratch_operands = 1 : i64, tpu.core_type = #tpu.core_type<tc>, window_params = [{transform_indices = @transform_0, window_bounds = array<i64: 1, 8, 32>}, {transform_indices = @transform_1, window_bounds = array<i64: 1, 1, 32>}, {transform_indices = @transform_2, window_bounds = array<i64: 1, 1, 32>}, {transform_indices = @transform_3, window_bounds = array<i64: 1, 32, 32>}, {transform_indices = @transform_4, window_bounds = array<i64: 1, 1, 32>}, {transform_indices = @transform_5, window_bounds = array<i64: 1, 32, 32>}, {transform_indices = @transform_6, window_bounds = array<i64: 1, 1, 32>}, {transform_indices = @transform_7, window_bounds = array<i64: 1, 32, 32>}, {transform_indices = @transform_8, window_bounds = array<i64: 1, 1, 32>}, {transform_indices = @transform_9, window_bounds = array<i64: 1, 32, 32>}, {transform_indices = @transform_10, window_bounds = array<i64: 1, 1, 32>}, {transform_indices = @transform_11, window_bounds = array<i64: 1, 1, 32>}, {transform_indices = @transform_12, window_bounds = array<i64: 1, 1, 32>}, {transform_indices = @transform_13, window_bounds = array<i64: 1, 32, 128>}, {transform_indices = @transform_14, window_bounds = array<i64: 1, 1, 128>}, {transform_indices = @transform_15, window_bounds = array<i64: 1, 128, 32>}, {transform_indices = @transform_16, window_bounds = array<i64: 1, 1, 32>}, {transform_indices = @transform_17, window_bounds = array<i64: 1, 8, 32>}]} {
    %c0_i32 = arith.constant 0 : i32
    %0 = arith.cmpi eq, %arg1, %c0_i32 : i32
    %1 = arith.extui %0 : i1 to i32
    %c0_i32_0 = arith.constant 0 : i32
    %2 = arith.cmpi ne, %1, %c0_i32_0 : i32
    scf.if %2 {
      %c0_77 = arith.constant 0 : index
      %c0_78 = arith.constant 0 : index
      %c0_79 = arith.constant 0 : index
      %180 = vector.load %arg2[%c0_77, %c0_78, %c0_79] : memref<1x8x32xf32, #tpu.memory_space<vmem>>, vector<1x8x32xf32>
      %181 = vector.shape_cast %180 : vector<1x8x32xf32> to vector<8x32xf32>
      %c0_80 = arith.constant 0 : index
      %c0_81 = arith.constant 0 : index
      %182 = vector.load %arg20[%c0_80, %c0_81] : memref<8x32xf32, #tpu.memory_space<vmem>>, vector<8x32xf32>
      tpu.vector_store %arg20[%c0_80, %c0_81], %181 {strides = array<i32>} : memref<8x32xf32, #tpu.memory_space<vmem>>, vector<8x32xf32>,
    } else {
    }
    %c0 = arith.constant 0 : index
    %c0_1 = arith.constant 0 : index
    %3 = vector.load %arg20[%c0, %c0_1] : memref<8x32xf32, #tpu.memory_space<vmem>>, vector<8x32xf32>
    %c0_2 = arith.constant 0 : index
    %c0_3 = arith.constant 0 : index
    %c0_4 = arith.constant 0 : index
    %4 = vector.load %arg3[%c0_2, %c0_3, %c0_4] : memref<1x1x32xf32, #tpu.memory_space<vmem>>, vector<1x1x32xf32>
    %5 = vector.shape_cast %4 : vector<1x1x32xf32> to vector<32xf32>
    %c0_5 = arith.constant 0 : index
    %c0_6 = arith.constant 0 : index
    %c0_7 = arith.constant 0 : index
    %6 = vector.load %arg4[%c0_5, %c0_6, %c0_7] : memref<1x1x32xf32, #tpu.memory_space<vmem>>, vector<1x1x32xf32>
    %7 = vector.shape_cast %6 : vector<1x1x32xf32> to vector<32xf32>
    %cst = arith.constant dense<0.000000e+00> : vector<8xf32>
    %8 = vector.multi_reduction <add>, %3, %cst [1] : vector<8x32xf32> to vector<8xf32>
    %9 = vector.shape_cast %8 : vector<8xf32> to vector<8x1xf32>
    %cst_8 = arith.constant 3.200000e+01 : f32
    %10 = vector.broadcast %cst_8 : f32 to vector<8x1xf32>
    %11 = arith.divf %9, %10 : vector<8x1xf32>
    %12 = vector.broadcast %11 : vector<8x1xf32> to vector<8x32xf32>
    %13 = arith.subf %3, %12 : vector<8x32xf32>
    %14 = arith.mulf %13, %13 : vector<8x32xf32>
    %cst_9 = arith.constant dense<0.000000e+00> : vector<8xf32>
    %15 = vector.multi_reduction <add>, %14, %cst_9 [1] : vector<8x32xf32> to vector<8xf32>
    %16 = vector.shape_cast %15 : vector<8xf32> to vector<8x1xf32>
    %cst_10 = arith.constant 3.200000e+01 : f32
    %17 = vector.broadcast %cst_10 : f32 to vector<8x1xf32>
    %18 = arith.divf %16, %17 : vector<8x1xf32>
    %19 = vector.broadcast %11 : vector<8x1xf32> to vector<8x32xf32>
    %20 = arith.subf %3, %19 : vector<8x32xf32>
    %cst_11 = arith.constant 9.99999974E-6 : f32
    %21 = vector.broadcast %cst_11 : f32 to vector<8x1xf32>
    %22 = arith.addf %18, %21 : vector<8x1xf32>
    %23 = math.rsqrt %22 : vector<8x1xf32>
    %24 = vector.broadcast %23 : vector<8x1xf32> to vector<8x32xf32>
    %25 = arith.mulf %20, %24 : vector<8x32xf32>
    %26 = vector.shape_cast %5 : vector<32xf32> to vector<1x32xf32>
    %27 = vector.broadcast %26 : vector<1x32xf32> to vector<8x32xf32>
    %28 = arith.mulf %25, %27 : vector<8x32xf32>
    %29 = vector.shape_cast %7 : vector<32xf32> to vector<1x32xf32>
    %30 = vector.broadcast %29 : vector<1x32xf32> to vector<8x32xf32>
    %31 = arith.addf %28, %30 : vector<8x32xf32>
    %c0_12 = arith.constant 0 : index
    %c0_13 = arith.constant 0 : index
    %c0_14 = arith.constant 0 : index
    %32 = vector.load %arg5[%c0_12, %c0_13, %c0_14] : memref<1x32x32xf32, #tpu.memory_space<vmem>>, vector<1x32x32xf32>
    %33 = vector.shape_cast %32 : vector<1x32x32xf32> to vector<32x32xf32>
    %cst_15 = arith.constant dense<0.000000e+00> : vector<8x32xf32>
    %34 = tpu.matmul %31, %33, %cst_15 {dimension_numbers = #tpu.dot_dimension_numbers<[1], [0], [0], [1], [0, 0, 1, 1], [], []>} : vector<8x32xf32>, vector<32x32xf32>, vector<8x32xf32> -> vector<8x32xf32>
    %c0_16 = arith.constant 0 : index
    %c0_17 = arith.constant 0 : index
    %c0_18 = arith.constant 0 : index
    %35 = vector.load %arg6[%c0_16, %c0_17, %c0_18] : memref<1x1x32xf32, #tpu.memory_space<vmem>>, vector<1x1x32xf32>
    %36 = vector.shape_cast %35 : vector<1x1x32xf32> to vector<32xf32>
    %37 = vector.shape_cast %36 : vector<32xf32> to vector<1x32xf32>
    %38 = vector.broadcast %37 : vector<1x32xf32> to vector<8x32xf32>
    %39 = arith.addf %34, %38 : vector<8x32xf32>
    %c0_19 = arith.constant 0 : index
    %c0_20 = arith.constant 0 : index
    %c0_21 = arith.constant 0 : index
    %40 = vector.load %arg7[%c0_19, %c0_20, %c0_21] : memref<1x32x32xf32, #tpu.memory_space<vmem>>, vector<1x32x32xf32>
    %41 = vector.shape_cast %40 : vector<1x32x32xf32> to vector<32x32xf32>
    %cst_22 = arith.constant dense<0.000000e+00> : vector<8x32xf32>
    %42 = tpu.matmul %31, %41, %cst_22 {dimension_numbers = #tpu.dot_dimension_numbers<[1], [0], [0], [1], [0, 0, 1, 1], [], []>} : vector<8x32xf32>, vector<32x32xf32>, vector<8x32xf32> -> vector<8x32xf32>
    %c0_23 = arith.constant 0 : index
    %c0_24 = arith.constant 0 : index
    %c0_25 = arith.constant 0 : index
    %43 = vector.load %arg8[%c0_23, %c0_24, %c0_25] : memref<1x1x32xf32, #tpu.memory_space<vmem>>, vector<1x1x32xf32>
    %44 = vector.shape_cast %43 : vector<1x1x32xf32> to vector<32xf32>
    %45 = vector.shape_cast %44 : vector<32xf32> to vector<1x32xf32>
    %46 = vector.broadcast %45 : vector<1x32xf32> to vector<8x32xf32>
    %47 = arith.addf %42, %46 : vector<8x32xf32>
    %c0_26 = arith.constant 0 : index
    %c0_27 = arith.constant 0 : index
    %c0_28 = arith.constant 0 : index
    %48 = vector.load %arg9[%c0_26, %c0_27, %c0_28] : memref<1x32x32xf32, #tpu.memory_space<vmem>>, vector<1x32x32xf32>
    %49 = vector.shape_cast %48 : vector<1x32x32xf32> to vector<32x32xf32>
    %cst_29 = arith.constant dense<0.000000e+00> : vector<8x32xf32>
    %50 = tpu.matmul %31, %49, %cst_29 {dimension_numbers = #tpu.dot_dimension_numbers<[1], [0], [0], [1], [0, 0, 1, 1], [], []>} : vector<8x32xf32>, vector<32x32xf32>, vector<8x32xf32> -> vector<8x32xf32>
    %c0_30 = arith.constant 0 : index
    %c0_31 = arith.constant 0 : index
    %c0_32 = arith.constant 0 : index
    %51 = vector.load %arg10[%c0_30, %c0_31, %c0_32] : memref<1x1x32xf32, #tpu.memory_space<vmem>>, vector<1x1x32xf32>
    %52 = vector.shape_cast %51 : vector<1x1x32xf32> to vector<32xf32>
    %53 = vector.shape_cast %52 : vector<32xf32> to vector<1x32xf32>
    %54 = vector.broadcast %53 : vector<1x32xf32> to vector<8x32xf32>
    %55 = arith.addf %50, %54 : vector<8x32xf32>
    %56 = vector.extract_strided_slice %39 {offsets = [0, 0], sizes = [8, 8], strides = [1, 1]} : vector<8x32xf32> to vector<8x8xf32>
    %57 = vector.extract_strided_slice %39 {offsets = [0, 8], sizes = [8, 8], strides = [1, 1]} : vector<8x32xf32> to vector<8x8xf32>
    %58 = vector.extract_strided_slice %39 {offsets = [0, 16], sizes = [8, 8], strides = [1, 1]} : vector<8x32xf32> to vector<8x8xf32>
    %59 = vector.extract_strided_slice %39 {offsets = [0, 24], sizes = [8, 8], strides = [1, 1]} : vector<8x32xf32> to vector<8x8xf32>
    %60 = vector.shape_cast %56 : vector<8x8xf32> to vector<1x8x8xf32>
    %61 = vector.shape_cast %57 : vector<8x8xf32> to vector<1x8x8xf32>
    %62 = vector.shape_cast %58 : vector<8x8xf32> to vector<1x8x8xf32>
    %63 = vector.shape_cast %59 : vector<8x8xf32> to vector<1x8x8xf32>
    %64 = tpu.concatenate %60, %61, %62, %63 in 0 : vector<1x8x8xf32>, vector<1x8x8xf32>, vector<1x8x8xf32>, vector<1x8x8xf32> -> vector<4x8x8xf32>
    %65 = vector.extract_strided_slice %47 {offsets = [0, 0], sizes = [8, 8], strides = [1, 1]} : vector<8x32xf32> to vector<8x8xf32>
    %66 = vector.extract_strided_slice %47 {offsets = [0, 8], sizes = [8, 8], strides = [1, 1]} : vector<8x32xf32> to vector<8x8xf32>
    %67 = vector.extract_strided_slice %47 {offsets = [0, 16], sizes = [8, 8], strides = [1, 1]} : vector<8x32xf32> to vector<8x8xf32>
    %68 = vector.extract_strided_slice %47 {offsets = [0, 24], sizes = [8, 8], strides = [1, 1]} : vector<8x32xf32> to vector<8x8xf32>
    %69 = vector.shape_cast %65 : vector<8x8xf32> to vector<1x8x8xf32>
    %70 = vector.shape_cast %66 : vector<8x8xf32> to vector<1x8x8xf32>
    %71 = vector.shape_cast %67 : vector<8x8xf32> to vector<1x8x8xf32>
    %72 = vector.shape_cast %68 : vector<8x8xf32> to vector<1x8x8xf32>
    %73 = tpu.concatenate %69, %70, %71, %72 in 0 : vector<1x8x8xf32>, vector<1x8x8xf32>, vector<1x8x8xf32>, vector<1x8x8xf32> -> vector<4x8x8xf32>
    %74 = vector.extract_strided_slice %55 {offsets = [0, 0], sizes = [8, 8], strides = [1, 1]} : vector<8x32xf32> to vector<8x8xf32>
    %75 = vector.extract_strided_slice %55 {offsets = [0, 8], sizes = [8, 8], strides = [1, 1]} : vector<8x32xf32> to vector<8x8xf32>
    %76 = vector.extract_strided_slice %55 {offsets = [0, 16], sizes = [8, 8], strides = [1, 1]} : vector<8x32xf32> to vector<8x8xf32>
    %77 = vector.extract_strided_slice %55 {offsets = [0, 24], sizes = [8, 8], strides = [1, 1]} : vector<8x32xf32> to vector<8x8xf32>
    %78 = vector.shape_cast %74 : vector<8x8xf32> to vector<1x8x8xf32>
    %79 = vector.shape_cast %75 : vector<8x8xf32> to vector<1x8x8xf32>
    %80 = vector.shape_cast %76 : vector<8x8xf32> to vector<1x8x8xf32>
    %81 = vector.shape_cast %77 : vector<8x8xf32> to vector<1x8x8xf32>
    %82 = tpu.concatenate %78, %79, %80, %81 in 0 : vector<1x8x8xf32>, vector<1x8x8xf32>, vector<1x8x8xf32>, vector<1x8x8xf32> -> vector<4x8x8xf32>
    "tpu.trace_start"() <{level = 10 : i32, message = "hqd,hkd->hqk"}> : () -> ()
    %cst_33 = arith.constant dense<0.000000e+00> : vector<4x8x8xf32>
    %83 = tpu.matmul %64, %73, %cst_33 {dimension_numbers = #tpu.dot_dimension_numbers<[2], [2], [1], [1], [0, 0, 0, 1, 1, 1], [0], [0]>} : vector<4x8x8xf32>, vector<4x8x8xf32>, vector<4x8x8xf32> -> vector<4x8x8xf32>
    "tpu.trace_stop"() : () -> ()
    %cst_34 = arith.constant 0.353553385 : f32
    %84 = vector.broadcast %cst_34 : f32 to vector<4x8x8xf32>
    %85 = arith.mulf %83, %84 : vector<4x8x8xf32>
    %86 = tpu.iota {dimensions = array<i32: 0>} : vector<8x8xi32>
    %87 = tpu.iota {dimensions = array<i32: 1>} : vector<8x8xi32>
    %88 = arith.cmpi sgt, %87, %86 : vector<8x8xi32>
    %89 = vector.shape_cast %88 : vector<8x8xi1> to vector<1x8x8xi1>
    %cst_35 = arith.constant 0xFF800000 : f32
    %90 = vector.shape_cast %89 : vector<1x8x8xi1> to vector<1x8x8xi1>
    %91 = vector.broadcast %90 : vector<1x8x8xi1> to vector<4x8x8xi1>
    %92 = vector.broadcast %cst_35 : f32 to vector<4x8x8xf32>
    %93 = arith.select %91, %92, %85 : vector<4x8x8xi1>, vector<4x8x8xf32>
    %cst_36 = arith.constant dense<0xFF800000> : vector<4x8xf32>
    %94 = vector.multi_reduction <maximumf>, %93, %cst_36 [2] : vector<4x8x8xf32> to vector<4x8xf32>
    %95 = vector.shape_cast %94 : vector<4x8xf32> to vector<4x8x1xf32>
    %96 = vector.broadcast %95 : vector<4x8x1xf32> to vector<4x8x8xf32>
    %97 = arith.subf %93, %96 : vector<4x8x8xf32>
    %98 = math.exp %97 : vector<4x8x8xf32>
    %cst_37 = arith.constant dense<0.000000e+00> : vector<4x8xf32>
    %99 = vector.multi_reduction <add>, %98, %cst_37 [2] : vector<4x8x8xf32> to vector<4x8xf32>
    %100 = vector.shape_cast %99 : vector<4x8xf32> to vector<4x8x1xf32>
    %101 = tpu.reciprocal %100 {approx = true} : vector<4x8x1xf32> -> vector<4x8x1xf32>
    %102 = vector.broadcast %101 : vector<4x8x1xf32> to vector<4x8x8xf32>
    %103 = arith.mulf %98, %102 : vector<4x8x8xf32>
    "tpu.trace_start"() <{level = 10 : i32, message = "hqk,hkd->hqd"}> : () -> ()
    %cst_38 = arith.constant dense<0.000000e+00> : vector<4x8x8xf32>
    %104 = tpu.matmul %103, %82, %cst_38 {dimension_numbers = #tpu.dot_dimension_numbers<[2], [1], [1], [2], [0, 0, 0, 1, 1, 2], [0], [0]>} : vector<4x8x8xf32>, vector<4x8x8xf32>, vector<4x8x8xf32> -> vector<4x8x8xf32>
    "tpu.trace_stop"() : () -> ()
    %105 = vector.extract_strided_slice %104 {offsets = [0, 0, 0], sizes = [1, 8, 8], strides = [1, 1, 1]} : vector<4x8x8xf32> to vector<1x8x8xf32>
    %106 = vector.shape_cast %105 : vector<1x8x8xf32> to vector<8x8xf32>
    %107 = vector.extract_strided_slice %104 {offsets = [1, 0, 0], sizes = [1, 8, 8], strides = [1, 1, 1]} : vector<4x8x8xf32> to vector<1x8x8xf32>
    %108 = vector.shape_cast %107 : vector<1x8x8xf32> to vector<8x8xf32>
    %109 = vector.extract_strided_slice %104 {offsets = [2, 0, 0], sizes = [1, 8, 8], strides = [1, 1, 1]} : vector<4x8x8xf32> to vector<1x8x8xf32>
    %110 = vector.shape_cast %109 : vector<1x8x8xf32> to vector<8x8xf32>
    %111 = vector.extract_strided_slice %104 {offsets = [3, 0, 0], sizes = [1, 8, 8], strides = [1, 1, 1]} : vector<4x8x8xf32> to vector<1x8x8xf32>
    %112 = vector.shape_cast %111 : vector<1x8x8xf32> to vector<8x8xf32>
    %113 = tpu.concatenate %106, %108, %110, %112 in 1 : vector<8x8xf32>, vector<8x8xf32>, vector<8x8xf32>, vector<8x8xf32> -> vector<8x32xf32>
    %c0_39 = arith.constant 0 : index
    %c0_40 = arith.constant 0 : index
    %c0_41 = arith.constant 0 : index
    %114 = vector.load %arg11[%c0_39, %c0_40, %c0_41] : memref<1x32x32xf32, #tpu.memory_space<vmem>>, vector<1x32x32xf32>
    %115 = vector.shape_cast %114 : vector<1x32x32xf32> to vector<32x32xf32>
    %cst_42 = arith.constant dense<0.000000e+00> : vector<8x32xf32>
    %116 = tpu.matmul %113, %115, %cst_42 {dimension_numbers = #tpu.dot_dimension_numbers<[1], [0], [0], [1], [0, 0, 1, 1], [], []>} : vector<8x32xf32>, vector<32x32xf32>, vector<8x32xf32> -> vector<8x32xf32>
    %c0_43 = arith.constant 0 : index
    %c0_44 = arith.constant 0 : index
    %c0_45 = arith.constant 0 : index
    %117 = vector.load %arg12[%c0_43, %c0_44, %c0_45] : memref<1x1x32xf32, #tpu.memory_space<vmem>>, vector<1x1x32xf32>
    %118 = vector.shape_cast %117 : vector<1x1x32xf32> to vector<32xf32>
    %119 = vector.shape_cast %118 : vector<32xf32> to vector<1x32xf32>
    %120 = vector.broadcast %119 : vector<1x32xf32> to vector<8x32xf32>
    %121 = arith.addf %116, %120 : vector<8x32xf32>
    %122 = arith.addf %3, %121 : vector<8x32xf32>
    %c0_46 = arith.constant 0 : index
    %c0_47 = arith.constant 0 : index
    %c0_48 = arith.constant 0 : index
    %123 = vector.load %arg13[%c0_46, %c0_47, %c0_48] : memref<1x1x32xf32, #tpu.memory_space<vmem>>, vector<1x1x32xf32>
    %124 = vector.shape_cast %123 : vector<1x1x32xf32> to vector<32xf32>
    %c0_49 = arith.constant 0 : index
    %c0_50 = arith.constant 0 : index
    %c0_51 = arith.constant 0 : index
    %125 = vector.load %arg14[%c0_49, %c0_50, %c0_51] : memref<1x1x32xf32, #tpu.memory_space<vmem>>, vector<1x1x32xf32>
    %126 = vector.shape_cast %125 : vector<1x1x32xf32> to vector<32xf32>
    %cst_52 = arith.constant dense<0.000000e+00> : vector<8xf32>
    %127 = vector.multi_reduction <add>, %122, %cst_52 [1] : vector<8x32xf32> to vector<8xf32>
    %128 = vector.shape_cast %127 : vector<8xf32> to vector<8x1xf32>
    %cst_53 = arith.constant 3.200000e+01 : f32
    %129 = vector.broadcast %cst_53 : f32 to vector<8x1xf32>
    %130 = arith.divf %128, %129 : vector<8x1xf32>
    %131 = vector.broadcast %130 : vector<8x1xf32> to vector<8x32xf32>
    %132 = arith.subf %122, %131 : vector<8x32xf32>
    %133 = arith.mulf %132, %132 : vector<8x32xf32>
    %cst_54 = arith.constant dense<0.000000e+00> : vector<8xf32>
    %134 = vector.multi_reduction <add>, %133, %cst_54 [1] : vector<8x32xf32> to vector<8xf32>
    %135 = vector.shape_cast %134 : vector<8xf32> to vector<8x1xf32>
    %cst_55 = arith.constant 3.200000e+01 : f32
    %136 = vector.broadcast %cst_55 : f32 to vector<8x1xf32>
    %137 = arith.divf %135, %136 : vector<8x1xf32>
    %138 = vector.broadcast %130 : vector<8x1xf32> to vector<8x32xf32>
    %139 = arith.subf %122, %138 : vector<8x32xf32>
    %cst_56 = arith.constant 9.99999974E-6 : f32
    %140 = vector.broadcast %cst_56 : f32 to vector<8x1xf32>
    %141 = arith.addf %137, %140 : vector<8x1xf32>
    %142 = math.rsqrt %141 : vector<8x1xf32>
    %143 = vector.broadcast %142 : vector<8x1xf32> to vector<8x32xf32>
    %144 = arith.mulf %139, %143 : vector<8x32xf32>
    %145 = vector.shape_cast %124 : vector<32xf32> to vector<1x32xf32>
    %146 = vector.broadcast %145 : vector<1x32xf32> to vector<8x32xf32>
    %147 = arith.mulf %144, %146 : vector<8x32xf32>
    %148 = vector.shape_cast %126 : vector<32xf32> to vector<1x32xf32>
    %149 = vector.broadcast %148 : vector<1x32xf32> to vector<8x32xf32>
    %150 = arith.addf %147, %149 : vector<8x32xf32>
    %c0_57 = arith.constant 0 : index
    %c0_58 = arith.constant 0 : index
    %c0_59 = arith.constant 0 : index
    %151 = vector.load %arg15[%c0_57, %c0_58, %c0_59] : memref<1x32x128xf32, #tpu.memory_space<vmem>>, vector<1x32x128xf32>
    %152 = vector.shape_cast %151 : vector<1x32x128xf32> to vector<32x128xf32>
    %cst_60 = arith.constant dense<0.000000e+00> : vector<8x128xf32>
    %153 = tpu.matmul %150, %152, %cst_60 {dimension_numbers = #tpu.dot_dimension_numbers<[1], [0], [0], [1], [0, 0, 1, 1], [], []>} : vector<8x32xf32>, vector<32x128xf32>, vector<8x128xf32> -> vector<8x128xf32>
    %c0_61 = arith.constant 0 : index
    %c0_62 = arith.constant 0 : index
    %c0_63 = arith.constant 0 : index
    %154 = vector.load %arg16[%c0_61, %c0_62, %c0_63] : memref<1x1x128xf32, #tpu.memory_space<vmem>>, vector<1x1x128xf32>
    %155 = vector.shape_cast %154 : vector<1x1x128xf32> to vector<128xf32>
    %156 = vector.shape_cast %155 : vector<128xf32> to vector<1x128xf32>
    %157 = vector.broadcast %156 : vector<1x128xf32> to vector<8x128xf32>
    %158 = arith.addf %153, %157 : vector<8x128xf32>
    %cst_64 = arith.constant 5.000000e-01 : f32
    %159 = vector.broadcast %cst_64 : f32 to vector<8x128xf32>
    %160 = arith.mulf %159, %158 : vector<8x128xf32>
    %cst_65 = arith.constant 1.41421354 : f32
    %161 = vector.broadcast %cst_65 : f32 to vector<8x128xf32>
    %162 = arith.divf %158, %161 : vector<8x128xf32>
    %163 = math.erf %162 : vector<8x128xf32>
    %cst_66 = arith.constant 1.000000e+00 : f32
    %164 = vector.broadcast %cst_66 : f32 to vector<8x128xf32>
    %165 = arith.addf %164, %163 : vector<8x128xf32>
    %166 = arith.mulf %160, %165 : vector<8x128xf32>
    %c0_67 = arith.constant 0 : index
    %c0_68 = arith.constant 0 : index
    %c0_69 = arith.constant 0 : index
    %167 = vector.load %arg17[%c0_67, %c0_68, %c0_69] : memref<1x128x32xf32, #tpu.memory_space<vmem>>, vector<1x128x32xf32>
    %168 = vector.shape_cast %167 : vector<1x128x32xf32> to vector<128x32xf32>
    %cst_70 = arith.constant dense<0.000000e+00> : vector<8x32xf32>
    %169 = tpu.matmul %166, %168, %cst_70 {dimension_numbers = #tpu.dot_dimension_numbers<[1], [0], [0], [1], [0, 0, 1, 1], [], []>} : vector<8x128xf32>, vector<128x32xf32>, vector<8x32xf32> -> vector<8x32xf32>
    %c0_71 = arith.constant 0 : index
    %c0_72 = arith.constant 0 : index
    %c0_73 = arith.constant 0 : index
    %170 = vector.load %arg18[%c0_71, %c0_72, %c0_73] : memref<1x1x32xf32, #tpu.memory_space<vmem>>, vector<1x1x32xf32>
    %171 = vector.shape_cast %170 : vector<1x1x32xf32> to vector<32xf32>
    %172 = vector.shape_cast %171 : vector<32xf32> to vector<1x32xf32>
    %173 = vector.broadcast %172 : vector<1x32xf32> to vector<8x32xf32>
    %174 = arith.addf %169, %173 : vector<8x32xf32>
    %175 = arith.addf %122, %174 : vector<8x32xf32>
    %c0_74 = arith.constant 0 : index
    %c0_75 = arith.constant 0 : index
    %176 = vector.load %arg20[%c0_74, %c0_75] : memref<8x32xf32, #tpu.memory_space<vmem>>, vector<8x32xf32>
    tpu.vector_store %arg20[%c0_74, %c0_75], %175 {strides = array<i32>} : memref<8x32xf32, #tpu.memory_space<vmem>>, vector<8x32xf32>,
    %c1_i32 = arith.constant 1 : i32
    %177 = arith.cmpi eq, %arg1, %c1_i32 : i32
    %178 = arith.extui %177 : i1 to i32
    %c0_i32_76 = arith.constant 0 : i32
    %179 = arith.cmpi ne, %178, %c0_i32_76 : i32
    scf.if %179 {
      %c0_77 = arith.constant 0 : index
      %c0_78 = arith.constant 0 : index
      %c0_79 = arith.constant 0 : index
      %180 = vector.load %arg19[%c0_77, %c0_78, %c0_79] : memref<1x8x32xf32, #tpu.memory_space<vmem>>, vector<1x8x32xf32>
      %181 = vector.shape_cast %180 : vector<1x8x32xf32> to vector<8x32xf32>
      %182 = vector.shape_cast %175 : vector<8x32xf32> to vector<1x8x32xf32>
      tpu.vector_store %arg19[%c0_77, %c0_78, %c0_79], %182 {strides = array<i32>} : memref<1x8x32xf32, #tpu.memory_space<vmem>>, vector<1x8x32xf32>,
    } else {
    }
    return
  }
  func.func @transform_0(%arg0: i32, %arg1: i32) -> (i32, i32, i32) {
    %c0_i32 = arith.constant 0 : i32
    %c0_i32_0 = arith.constant 0 : i32
    %c0_i32_1 = arith.constant 0 : i32
    return %arg0, %c0_i32, %c0_i32_0 : i32, i32, i32
  }
  func.func @transform_1(%arg0: i32, %arg1: i32) -> (i32, i32, i32) {
    %c0_i32 = arith.constant 0 : i32
    %c0_i32_0 = arith.constant 0 : i32
    %c0_i32_1 = arith.constant 0 : i32
    return %arg1, %c0_i32, %c0_i32_0 : i32, i32, i32
  }
  func.func @transform_2(%arg0: i32, %arg1: i32) -> (i32, i32, i32) {
    %c0_i32 = arith.constant 0 : i32
    %c0_i32_0 = arith.constant 0 : i32
    %c0_i32_1 = arith.constant 0 : i32
    return %arg1, %c0_i32, %c0_i32_0 : i32, i32, i32
  }
  func.func @transform_3(%arg0: i32, %arg1: i32) -> (i32, i32, i32) {
    %c0_i32 = arith.constant 0 : i32
    %c0_i32_0 = arith.constant 0 : i32
    %c0_i32_1 = arith.constant 0 : i32
    return %arg1, %c0_i32, %c0_i32_0 : i32, i32, i32
  }
  func.func @transform_4(%arg0: i32, %arg1: i32) -> (i32, i32, i32) {
    %c0_i32 = arith.constant 0 : i32
    %c0_i32_0 = arith.constant 0 : i32
    %c0_i32_1 = arith.constant 0 : i32
    return %arg1, %c0_i32, %c0_i32_0 : i32, i32, i32
  }
  func.func @transform_5(%arg0: i32, %arg1: i32) -> (i32, i32, i32) {
    %c0_i32 = arith.constant 0 : i32
    %c0_i32_0 = arith.constant 0 : i32
    %c0_i32_1 = arith.constant 0 : i32
    return %arg1, %c0_i32, %c0_i32_0 : i32, i32, i32
  }
  func.func @transform_6(%arg0: i32, %arg1: i32) -> (i32, i32, i32) {
    %c0_i32 = arith.constant 0 : i32
    %c0_i32_0 = arith.constant 0 : i32
    %c0_i32_1 = arith.constant 0 : i32
    return %arg1, %c0_i32, %c0_i32_0 : i32, i32, i32
  }
  func.func @transform_7(%arg0: i32, %arg1: i32) -> (i32, i32, i32) {
    %c0_i32 = arith.constant 0 : i32
    %c0_i32_0 = arith.constant 0 : i32
    %c0_i32_1 = arith.constant 0 : i32
    return %arg1, %c0_i32, %c0_i32_0 : i32, i32, i32
  }
  func.func @transform_8(%arg0: i32, %arg1: i32) -> (i32, i32, i32) {
    %c0_i32 = arith.constant 0 : i32
    %c0_i32_0 = arith.constant 0 : i32
    %c0_i32_1 = arith.constant 0 : i32
    return %arg1, %c0_i32, %c0_i32_0 : i32, i32, i32
  }
  func.func @transform_9(%arg0: i32, %arg1: i32) -> (i32, i32, i32) {
    %c0_i32 = arith.constant 0 : i32
    %c0_i32_0 = arith.constant 0 : i32
    %c0_i32_1 = arith.constant 0 : i32
    return %arg1, %c0_i32, %c0_i32_0 : i32, i32, i32
  }
  func.func @transform_10(%arg0: i32, %arg1: i32) -> (i32, i32, i32) {
    %c0_i32 = arith.constant 0 : i32
    %c0_i32_0 = arith.constant 0 : i32
    %c0_i32_1 = arith.constant 0 : i32
    return %arg1, %c0_i32, %c0_i32_0 : i32, i32, i32
  }
  func.func @transform_11(%arg0: i32, %arg1: i32) -> (i32, i32, i32) {
    %c0_i32 = arith.constant 0 : i32
    %c0_i32_0 = arith.constant 0 : i32
    %c0_i32_1 = arith.constant 0 : i32
    return %arg1, %c0_i32, %c0_i32_0 : i32, i32, i32
  }
  func.func @transform_12(%arg0: i32, %arg1: i32) -> (i32, i32, i32) {
    %c0_i32 = arith.constant 0 : i32
    %c0_i32_0 = arith.constant 0 : i32
    %c0_i32_1 = arith.constant 0 : i32
    return %arg1, %c0_i32, %c0_i32_0 : i32, i32, i32
  }
  func.func @transform_13(%arg0: i32, %arg1: i32) -> (i32, i32, i32) {
    %c0_i32 = arith.constant 0 : i32
    %c0_i32_0 = arith.constant 0 : i32
    %c0_i32_1 = arith.constant 0 : i32
    return %arg1, %c0_i32, %c0_i32_0 : i32, i32, i32
  }
  func.func @transform_14(%arg0: i32, %arg1: i32) -> (i32, i32, i32) {
    %c0_i32 = arith.constant 0 : i32
    %c0_i32_0 = arith.constant 0 : i32
    %c0_i32_1 = arith.constant 0 : i32
    return %arg1, %c0_i32, %c0_i32_0 : i32, i32, i32
  }
  func.func @transform_15(%arg0: i32, %arg1: i32) -> (i32, i32, i32) {
    %c0_i32 = arith.constant 0 : i32
    %c0_i32_0 = arith.constant 0 : i32
    %c0_i32_1 = arith.constant 0 : i32
    return %arg1, %c0_i32, %c0_i32_0 : i32, i32, i32
  }
  func.func @transform_16(%arg0: i32, %arg1: i32) -> (i32, i32, i32) {
    %c0_i32 = arith.constant 0 : i32
    %c0_i32_0 = arith.constant 0 : i32
    %c0_i32_1 = arith.constant 0 : i32
    return %arg1, %c0_i32, %c0_i32_0 : i32, i32, i32
  }
  func.func @transform_17(%arg0: i32, %arg1: i32) -> (i32, i32, i32) {
    %c0_i32 = arith.constant 0 : i32
    %c0_i32_0 = arith.constant 0 : i32
    %c0_i32_1 = arith.constant 0 : i32
    return %arg0, %c0_i32, %c0_i32_0 : i32, i32, i32
  }
}

</mosaic_0001>

<bundles_post_ra>
// kernel: tpu_custom_call.1
= control target key start
LH: loop header
LB: loop body
LE: loop exit
PB: predicated region body
PF: predicated region fallthrough
CT: control target
= control target key end

     0   :  { %s2918_s0 = inlined_call_operand.hbm [shape: f32[2,8,32], index: 0, kind: input, shape index: {}]   ;;  %s2919_s1 = inlined_call_operand.hbm [shape: f32[2,1,32], index: 1, kind: input, shape index: {}]   ;;  %s2920_s2 = inlined_call_operand.hbm [shape: f32[2,1,32], index: 2, kind: input, shape index: {}]   ;;  %s2921_s3 = inlined_call_operand.vmem [shape: f32[2,32,32], index: 3, kind: input, shape index: {}]   ;;  %s2922_s4 = inlined_call_operand.vmem [shape: f32[2,1,32], index: 4, kind: input, shape index: {}]   ;;  %s2923_s5 = inlined_call_operand.vmem [shape: f32[2,32,32], index: 5, kind: input, shape index: {}]   ;;  %s2924_s6 = inlined_call_operand.hbm [shape: f32[2,1,32], index: 6, kind: input, shape index: {}]   ;;  %s2925_s7 = inlined_call_operand.vmem [shape: f32[2,32,32], index: 7, kind: input, shape index: {}]   ;;  %s2926_s8 = inlined_call_operand.vmem [shape: f32[2,1,32], index: 8, kind: input, shape index: {}]   ;;  %s2927_s9 = inlined_call_operand.vmem [shape: f32[2,32,32], index: 9, kind: input, shape index: {}]   ;;  %s2928_s10 = inlined_call_operand.vmem [shape: f32[2,1,32], index: 10, kind: input, shape index: {}]   ;;  %s2929_s11 = inlined_call_operand.hbm [shape: f32[2,1,32], index: 11, kind: input, shape index: {}]   ;;  %s2930_s12 = inlined_call_operand.vmem [shape: f32[2,1,32], index: 12, kind: input, shape index: {}]   ;;  %s2931_s13 = inlined_call_operand.vmem [shape: f32[2,32,128], index: 13, kind: input, shape index: {}]   ;;  %s2932_s14 = inlined_call_operand.vmem [shape: f32[2,1,128], index: 14, kind: input, shape index: {}]   ;;  %s2933_s15 = inlined_call_operand.vmem [shape: f32[2,128,32], index: 15, kind: input, shape index: {}]   ;;  %s2934_s16 = inlined_call_operand.vmem [shape: f32[2,1,32], index: 16, kind: input, shape index: {}]   ;;  %s2935_s17 = inlined_call_operand.hbm [shape: f32[2,8,32], index: 17, kind: output, shape index: {}]  }
   0x1   :  { %2953 = sst [smem:[#allocation33_spill]] %s2918_s0 }
   0x2   :  { %2954 = sst [smem:[#allocation34_spill]] %s2919_s1 }
   0x3   :  { %2955 = sst [smem:[#allocation35_spill]] %s2920_s2 }
   0x4   :  { %2956 = sst [smem:[#allocation36_spill]] %s2921_s3 }
   0x5   :  { %2957 = sst [smem:[#allocation37_spill]] %s2922_s4 }
   0x6   :  { %2958 = sst [smem:[#allocation38_spill]] %s2923_s5 }
   0x7   :  { %2959 = sst [smem:[#allocation39_spill]] %s2924_s6 }
   0x8   :  { %2960 = sst [smem:[#allocation40_spill]] %s2925_s7 }
   0x9   :  { %2961 = sst [smem:[#allocation41_spill]] %s2926_s8 }
   0xa   :  { %2962 = sst [smem:[#allocation42_spill]] %s2927_s9 }
   0xb   :  { %2963 = sst [smem:[#allocation43_spill]] %s2928_s10 }
   0xc   :  { %2964 = sst [smem:[#allocation44_spill]] %s2929_s11 }
   0xd   :  { %2965 = sst [smem:[#allocation45_spill]] %s2930_s12 }
   0xe   :  { %2966 = sst [smem:[#allocation46_spill]] %s2931_s13 }
   0xf   :  { %2967 = sst [smem:[#allocation47_spill]] %s2932_s14 }
  0x10   :  { %2968 = sst [smem:[#allocation48_spill]] %s2933_s15 }
  0x11   :  { %2969 = sst [smem:[#allocation49_spill]] %s2934_s16 }
  0x12   :  { %2970 = sst [smem:[#allocation50_spill]] %s2935_s17 }
  0x13   :  { %22 = vsyncpa [#allocation4], 0 }
  0x14   :  { %24 = vsyncpa [#allocation4 + $0x1], 0 }
  0x15   :  { %25 = vsyncpa [#allocation7], 0 }
  0x16   :  { %27 = vsyncpa [#allocation7 + $0x1], 0 }
  0x17   :  { %28 = vsyncpa [#allocation10], 0 }
  0x18   :  { %30 = vsyncpa [#allocation10 + $0x1], 0 }
  0x19   :  { %31 = vsyncpa [#allocation5], 0 }
  0x1a   :  { %33 = vsyncpa [#allocation5 + $0x1], 0  ;;  %s2423_s24 = smov 0   ;;  %s2425_s25 = smov 0  }
  0x1b   :  { %s2427_s26 = smov 0   ;;  %s2429_s27 = smov 0  }
  0x1c   :  { %s2431_s28 = smov 0   ;;  %s2433_s29 = smov 0  }
  0x1d   :  { %s2435_s0 = smov 0   ;;  %s2437_s30 = smov 0  }
  0x1e   :  { %s2439_s18 = smov 0   ;;  %s2441_s19 = smov 0  }
  0x1f   :  { %s2443_s1 = smov 0  }
  0x20 LB: > { %2971 = sst [smem:[#allocation17_spill]] %s2287_s25  ;;  %s48_s20 = sadd.s32 1, %s2315_s18  ;;  %s2323_s1 = sphi %s2443_s1, %s39_s1   ;;  %s2319_s19 = sphi %s2441_s19, %s3043_s19   ;;  %s2315_s18 = sphi %s2439_s18, %s3042_s18   ;;  %s2311_s30 = sphi %s2437_s30, %s3041_s30   ;;  %s2307_s0 = sphi %s2435_s0, %s3040_s0   ;;  %s2303_s29 = sphi %s2433_s29, %s3039_s29   ;;  %s2299_s28 = sphi %s2431_s28, %s3038_s28   ;;  %s2295_s27 = sphi %s2429_s27, %s3037_s27   ;;  %s2291_s26 = sphi %s2427_s26, %s3036_s26   ;;  %s2287_s25 = sphi %s2425_s25, %s3035_s25   ;;  %s2283_s24 = sphi %s2423_s24, %s3034_s24  }
  0x21   : > { %2972 = sst [smem:[#allocation18_spill]] %s2291_s26  ;;  %p66_p0 = scmp.eq.s32.totalorder %s2323_s1, 0 }
  0x22   : > { %2973 = sst [smem:[#allocation19_spill]] %s2295_s27  ;;  %p2480_p1 = scmp.ge.s32.totalorder %s48_s20, 2 }
  0x23   : > { %2974 = sst [smem:[#allocation20_spill]] %s2299_s28  ;;  %s84_s22 = sadd.s32 1, %s2291_s26 }
  0x24   : > { %2975 = sst [smem:[#allocation21_spill]] %s2303_s29  ;;  %p91_p2 = scmp.ne.s32.totalorder %s2291_s26, %s2287_s25 }
  0x25   : > { %2976 = sst [smem:[#allocation22_spill]] %s2307_s0  ;;  %p97_p3 = scmp.ne.s32.totalorder %s2287_s25, %s2283_s24 }
  0x26   : > { %2977 = sst [smem:[#allocation23_spill]] %s2311_s30  ;;  %s3045_s20 = smov (%p2480_p1, %s48_s20), 0 }
  0x27   : > { %2978 = sst [smem:[#allocation24_spill]] %s2315_s18  ;;  %p2495_p4 = por %p91_p2, %p66_p0 }
  0x28   : > { %2979 = sst [smem:[#allocation25_spill]] %s2319_s19  ;;  %s81_s17 = ssub.s32 %s2315_s18, %s3045_s20 }
  0x29   : > { %2980 = sst [smem:[#allocation26_spill]] %s2323_s1  ;;  %p1909_p5 = scmp.lt.s32.totalorder %s2323_s1, 4 }
  0x2a   : > { %2982 = sst [smem:[#allocation27_spill]] %s3045_s20  ;;  %p82_p6 = scmp.eq.s32.totalorder %s81_s17, 0 }
  0x2b   : > { %s556_s30 = sand.u32 1, %s2323_s1   ;;  %s2504_s16 = sand.u32 1, %s2291_s26  }
  0x2c   : > { %s2507_s15 = scalar_select %p82_p6, %s2291_s26, %s84_s22  }
  0x2d   : > { %s2985_s12 = sld [smem:[#allocation34_spill]]  ;;  %s559_s8 = scalar_lea.vmem [#allocation6], %s2504_s16 }
  0x2e   : > { %2984 = sst [smem:[#allocation28_spill]] %s2507_s15  ;;  %s566_s7 = sshll.u32 %s559_s8, 4  ;;  %s567_s7 = int_to_ptr.vmem [resolvable:$true] %s566_s7 }
  0x2f   : > { %p2518_p7 = pnand %p1909_p5, %p2495_p4  ;;  %p1832_p8 = scmp.ge.s32.totalorder %s2323_s1, 1 }
  0x30   : > { %p706_p9 = scmp.lt.s32.totalorder %s2323_s1, 5  ;;  %s2988_s6 = sld [smem:[#allocation39_spill]] }
  0x31   : > { %s615_s23 = scalar_lea.vmem [#allocation9], %s2504_s16  ;;  %s51_s13 = sadd.s32 1, %s2319_s19 }
  0x32   : > { %p2529_p10 = pnand %p1832_p8, %p706_p9  ;;  %s622_s20 = sshll.u32 %s615_s23, 4  ;;  %s623_s20 = int_to_ptr.vmem [resolvable:$true] %s622_s20 }
  0x33   : > { %s562_s10 = scalar_lea.hbm %s2985_s12, %s2315_s18  ;;  %s1827_s12 = sadd.s32 4294967294, %s2323_s1  }
  0x34   : > { %s564_s9 = sshll.u32 %s562_s10, 4  ;;  %s2524_s10 = scalar_lea.sflag [#allocation7], %s556_s30  ;;  %s565_s9 = int_to_ptr.hbm [resolvable:$true] %s564_s9 }
  0x35   : > { %1895 = dma.hbm_to_vmem [thread:$0]  (!%p2518_p7), %s565_s9, 16, %s567_s7, %s2524_s10  }
  0x36   : > { %s618_s14 = scalar_lea.hbm %s2988_s6, %s2315_s18  ;;  %s2538_s7 = scalar_lea.sflag [#allocation10], %s556_s30 }
  0x37   : > { %s620_s22 = sshll.u32 %s618_s14, 4  ;;  %s2544_s9 = sadd.s32 4294967295, %s2323_s1   ;;  %s621_s22 = int_to_ptr.hbm [resolvable:$true] %s620_s22 }
  0x38   : > { %1901 = dma.hbm_to_vmem [thread:$0]  (!%p2518_p7), %s621_s22, 16, %s623_s20, %s2538_s7  }
  0x39   : > { %s58_s14 = sadd.s32 1, %s2303_s29  ;;  %s3047_s13 = smov (!%p2480_p1, %s51_s13), %s2319_s19 }
  0x3a   : > { %p65_p11 = scmp.ne.s32.totalorder %s2303_s29, %s2299_s28  ;;  %p71_p12 = scmp.ne.s32.totalorder %s2299_s28, %s2295_s27 }
  0x3b   : > { %p53_p13 = scmp.ge.s32.totalorder %s3047_s13, 2  ;;  %p72_p2 = scmp.eq.s32.totalorder %s2544_s9, 0 }
  0x3c   : > { %p2559_p4 = por %p66_p0, %p65_p11  ;;  %p511_p6 = scmp.eq.s32.totalorder %s2544_s9, 3 }
  0x3d   : > { %s3049_s13 = smov (%p53_p13, %s3047_s13), 0  ;;  %p2569_p8 = por %p72_p2, %p71_p12 }
  0x3e   : > { %2990 = sst [smem:[#allocation29_spill]] %s3049_s13  ;;  %p2576_p1 = por %p97_p3, %p72_p2 }
  0x3f   : > { %s55_s22 = ssub.s32 %s2319_s19, %s3049_s13  ;;  %p2582_p0 = por %p511_p6, %p65_p11 }
  0x40   : > { %p56_p9 = scmp.eq.s32.totalorder %s55_s22, 0  ;;  %p517_p13 = scmp.eq.s32.totalorder %s1827_s12, 3 }
  0x41   : > { %s2993_s23 = scalar_select %p2582_p0, 1, 0 }
  0x42   : > { %s537_s6 = sand.u32 1, %s2303_s29   ;;  %s1831_s15 = sshll.u32 %s2319_s19, 3 }
  0x43   : > { %2994 = sst [smem:[#allocation30_spill]] %s2993_s23  ;;  %p2594_p3 = por %p517_p13, %p71_p12 }
  0x44   : > { %s2589_s26 = scalar_select %p56_p9, %s2303_s29, %s58_s14  }
  0x45   : > { %s2996_s24 = scalar_select %p2594_p3, 1, 0 }
  0x46   : > { %2995 = sst [smem:[#allocation31_spill]] %s2589_s26  ;;  %s1830_s5 = sshll.u32 %s537_s6, 3 }
  0x47   : > { %2997 = sst [smem:[#allocation32_spill]] %s2996_s24  ;;  %s541_s12 = scalar_lea.vmem [#allocation3], %s1830_s5 }
  0x48   : > { %s2998_s4 = sld [smem:[#allocation33_spill]]  ;;  %s549_s19 = sshll.u32 %s541_s12, 4  ;;  %s550_s19 = int_to_ptr.vmem [resolvable:$true] %s549_s19 }
  0x49   : > { %p1890_p11 = pnand %p1909_p5, %p2559_p4  ;;  %s2999_s2 = sld [smem:[#allocation35_spill]] }
  0x4a   : > { %s538_s13 = scalar_lea.sflag [#allocation4], %s537_s6  ;;  %s3000_s11 = sld [smem:[#allocation44_spill]] }
  0x4b   : > { %s660_s12 = scalar_lea.vmem [#allocation11], %s2504_s16  ;;  %s2624_s6 = sand.u32 (!%p2529_p10), 1, %s2299_s28  }
  0x4c   : > { %s667_s24 = sshll.u32 %s660_s12, 4  ;;  %s2945_s26 = sshll.u32 (!%p2529_p10), %s2624_s6, 3  ;;  %s668_s24 = int_to_ptr.vmem [resolvable:$true] %s667_s24 }
  0x4e   : > { %s545_s0 = scalar_lea.hbm %s2998_s4, %s1831_s15  ;;  %s576_s4 = scalar_lea.vmem [#allocation8], %s2504_s16 }
  0x4f   : > { %s547_s22 = sshll.u32 %s545_s0, 4  ;;  %s579_s29 = scalar_lea.hbm %s2999_s2, %s2315_s18  ;;  %s548_s22 = int_to_ptr.hbm [resolvable:$true] %s547_s22 }
  0x50   : > { %s581_s3 = sshll.u32 %s579_s29, 4  ;;  %s583_s15 = sshll.u32 %s576_s4, 4  ;;  %s582_s3 = int_to_ptr.hbm [resolvable:$true] %s581_s3  ;;  %s584_s15 = int_to_ptr.vmem [resolvable:$true] %s583_s15 }
  0x51   : > { %1892 = dma.hbm_to_vmem [thread:$0]  (!%p1890_p11), %s548_s22, 128, %s550_s19, %s538_s13  }
  0x52   : > { %1898 = dma.hbm_to_vmem [thread:$0]  (!%p2518_p7), %s582_s3, 16, %s584_s15, %s2524_s10  }
  0x53   : > { %s663_s30 = scalar_lea.hbm %s3000_s11, %s2315_s18  ;;  %710 = sbr.rel (%p2529_p10) target bundleno = 2049 (0x801), region = 88 }
  0x54   : > { %s665_s27 = sshll.u32 %s663_s30, 4  ;;  %s713_s29 = scalar_lea.sflag (!%p2529_p10), [#allocation4], %s2624_s6  ;;  %s666_s27 = int_to_ptr.hbm [resolvable:$true] %s665_s27 }
  0x55   : > { %1904 = dma.hbm_to_vmem [thread:$0]  (!%p2518_p7), %s666_s27, 16, %s668_s24, %s2538_s7  }
  0x56   : > { %s2630_s16 = scalar_lea.vmem (!%p2529_p10), [#allocation3], %s2945_s26 }
  0x58   : > { %2266 = dma.done.wait (%p2569_p8), %s713_s29, 128  }
  0x59   : > { %2268 = vsyncadd (%p2569_p8), %s713_s29, 4294967168  ;;  %s722_s27 = sand.u32 1, %s2544_s9   ;;  %s2638_s19 = sand.u32 1, %s2287_s25  }
  0x5a   : > { %s723_s17 = scalar_lea.sflag [#allocation7], %s722_s27 }
  0x5b   : > { %2270 = dma.done.wait (%p2576_p1), %s723_s17, 32  }
  0x5c   : > { %2272 = vsyncadd (%p2576_p1), %s723_s17, 4294967264  ;;  %s741_s7 = scalar_lea.sflag [#allocation10], %s722_s27 }
  0x5d   : > { %2274 = dma.done.wait (%p2576_p1), %s741_s7, 32  }
  0x5e   : > { %2276 = vsyncadd (%p2576_p1), %s741_s7, 4294967264  ;;  %s3001_s9 = sld [smem:[#allocation22_spill]]  ;;  %s752_s18 = scalar_lea.vmem [#allocation11], %s2638_s19 }
  0x5f   : > { %s3003_s5 = sld [smem:[#allocation36_spill]] }
  0x60   : > { %s3004_s29 = sld [smem:[#allocation38_spill]] }
  0x61   : > { %s3005_s20 = sld [smem:[#allocation40_spill]] }
  0x62   : > { %s3007_s13 = sld [smem:[#allocation42_spill]] }
  0x63   : > { %s3008_s11 = sld [smem:[#allocation43_spill]] }
  0x64   : > { %p868_p5 = scmp.lt.s32.totalorder %s3001_s9, 1  ;;  %s3010_s7 = sld [smem:[#allocation46_spill]] }
  0x65   : > { %s3011_s10 = sld [smem:[#allocation47_spill]]  ;;  %p1847_p7 = scmp.ne.s32.totalorder %s3001_s9, 0 }
  0x66   : > { %s2653_s24 = scalar_select %p868_p5, %s3001_s9, 1 }
  0x67   : > { %s3012_s1 = sld [smem:[#allocation48_spill]] }
  0x68   : > { %s1871_s22 = sshll.u32 %s2653_s24, 5  ;;  %s1876_s3 = sshll.u32 %s2653_s24, 7 }
  0x69   : > { %s2663_s0 = scalar_lea.vmem %s3003_s5, %s1871_s22  ;;  %s2668_s27 = scalar_lea.vmem %s3004_s29, %s1871_s22 }
  0x6a   : > { %s2673_s8 = scalar_lea.vmem %s3005_s20, %s1871_s22  ;;  %s2682_s4 = scalar_lea.vmem %s3007_s13, %s1871_s22 }
  0x6b   : > { %s896_s30 = scalar_lea.vmem %s3008_s11, %s2653_s24  ;;  %s2695_s25 = scalar_lea.vmem %s3010_s7, %s1871_s22 }
  0x6c   : > { %s907_s14 = scalar_lea.vmem %s3011_s10, %s2653_s24  ;;  %s3013_s5 = sld [smem:[#allocation49_spill]] }
  0x6d   : > { %s2705_s23 = scalar_lea.vmem %s3012_s1, %s1876_s3  ;;  %s3014_s29 = sshll.u32 %s2624_s6, 3 }
  0x6e   : > { %s2714_s28 = scalar_lea.vmem [#allocation12], %s3014_s29  ;;  %919 = sbr.rel (%p1847_p7) target bundleno = 117 (0x75), region = 112 }
  0x72   : > { %s915_s12 = scalar_lea.vmem %s3013_s5, %s2653_s24 }
  0x73   : > { %v920_v0 = vld [vmem:[%s2630_s16] sm:$0xff]  ;;  %vm921_vm0 = vcmask 261120  }
  0x74   : > { %922 = vst.msk [vmem:[#allocation2] sm:$0xff] %vm921_vm0, %v920_v0 }
  0x75 PF: > { %vm926_vm1 = vcmask 261120   ;;  %v2325_v3 = vmov 32.0   ;;  %v967_v15 = vld [vmem:[%s2663_s0 + $0x18] sm:$0xff]  ;;  %v966_v17 = vld [vmem:[%s2663_s0 + $0x10] sm:$0xff]  ;;  %v965_v19 = vld [vmem:[%s2663_s0 + $0x8] sm:$0xff]  ;;  %s3015_s1 = scalar_lea.vmem [#allocation6], %s2638_s19  ;;  %v1176_v57 = vlaneseq }
  0x76   : > { %2017 = vrcp.f32 %v2325_v3  ;;  %v1026_v16 = vld [vmem:[%s2673_s8 + $0x18] sm:$0xff]  ;;  %987 = vmatpush.msra.mxu1 %v967_v15  ;;  %v1025_v18 = vld [vmem:[%s2673_s8 + $0x10] sm:$0xff]  ;;  %v1024_v20 = vld [vmem:[%s2673_s8 + $0x8] sm:$0xff]  ;;  %s3016_s16 = scalar_lea.vmem [#allocation8], %s2638_s19  ;;  %vm1075_vm6 = vcmask 64512   ;;  %s2326_s17 = smov 104  }
  0x77   : > { %1043 = vmatpush.msra.mxu2 %v1026_v16  ;;  %v964_v21 = vld [vmem:[%s2663_s0] sm:$0xff]  ;;  %v998_v23 = vld [vmem:[%s2668_s27 + $0x18] sm:$0xff]  ;;  %v997_v24 = vld [vmem:[%s2668_s27 + $0x10] sm:$0xff]  ;;  %s3018_s0 = sld [smem:[#allocation37_spill]]  ;;  %s2327_s20 = smov 112   ;;  %v1177_v58 = vshrl.u32 %v1176_v57, 7 }
  0x78   : > { %988 = vmatpush.msra.mxu1 %v966_v17  ;;  %v1023_v22 = vld [vmem:[%s2673_s8] sm:$0xff]  ;;  %v996_v25 = vld [vmem:[%s2668_s27 + $0x8] sm:$0xff]  ;;  %s3017_s8 = scalar_lea.vmem [#allocation9], %s2638_s19  ;;  %s2328_s7 = smov 120   ;;  %v1179_v59 = vand.u32 127, %v1176_v57  ;;  %vm1336_vm8 = vcmask 130048  }
  0x79   : > { %1044 = vmatpush.msra.mxu2 %v1025_v18  ;;  %v995_v28 = vld [vmem:[%s2668_s27] sm:$0xff]  ;;  %s3020_s10 = sld [smem:[#allocation41_spill]]  ;;  %s2329_s13 = smov 16   ;;  %vm1338_vm9 = vcmask 195584  }
  0x7a   : > { %989 = vmatpush.msra.mxu1 %v965_v19  ;;  %v2007_v36 = vld [vmem:[%s3015_s1] ss:$0 sm:$0xff]  ;;  %vm1180_vm7 = vcmp.gt.s32.totalorder %v1179_v59, %v1177_v58  ;;  %s2330_s21 = smov 8   ;;  %s2331_s11 = smov 24  }
  0x7b   : > { %v2718_v1 = vld [vmem:[#allocation2] sm:$0xff]  ;;  %1045 = vmatpush.msra.mxu2 %v1024_v20  ;;  %s3027_s9 = sld [smem:[#allocation22_spill]] }
  0x7c   : > { %v927_v2 = vsel %vm926_vm1, %v2718_v1, 0.0  ;;  %v2018_v4 = vpop.eup %2017  ;;  %990 = vmatpush.msra.mxu1 %v964_v21  ;;  %v2008_v39 = vld [vmem:[%s3016_s16] ss:$0 sm:$0xff] }
  0x7d   : > { %928 = vadd.xlane.f32.xlu0 %v927_v2  ;;  %v931_v5 = vmul.f32 32.0, %v2018_v4  ;;  %vm935_vm2 = vweird.f32 %v2018_v4  ;;  %1046 = vmatpush.msra.mxu2 %v1023_v22  ;;  %v2011_v43 = vld [vmem:[%s3017_s8] ss:$0 sm:$0xff]  ;;  %s3019_s27 = scalar_lea.vmem %s3018_s0, %s2653_s24 }
  0x7e   : > { %1015 = vmatpush.msrb.mxu1 %v998_v23  ;;  %v2009_v45 = vld [vmem:[%s3019_s27] ss:$0 sm:$0xff] }
  0x7f   : > { %v932_v6 = vsub.f32 1.0, %v931_v5  ;;  %s3021_s3 = scalar_lea.vmem %s3020_s10, %s2653_s24 }
  0x80   : > { %1016 = vmatpush.msrb.mxu1 %v997_v24  ;;  %v2010_v48 = vld [vmem:[%s3021_s3] ss:$0 sm:$0xff] }
  0x81   : > { %v933_v7 = vmul.f32 %v2018_v4, %v932_v6  ;;  %p1866_p10 = scmp.ne.s32.totalorder %s3027_s9, 1 }
  0x82   : > { %1017 = vmatpush.msrb.mxu1 %v996_v25 }
  0x83   : > { %v934_v8 = vadd.f32 %v2018_v4, %v933_v7 }
  0x84   : > { %1018 = vmatpush.msrb.mxu1 %v995_v28 }
  0x85   : > { %v2722_v9 = vsel %vm935_vm2, %v2018_v4, %v934_v8 }
  0xf0   : > { %v929_v10 = vpop.xlane.xlu0 %928 }
  0xf1   : > { %v937_v11 = vmul.f32 %v2722_v9, %v929_v10 }
  0xf3   : > { %v938_v12 = vsub.f32 %v2718_v1, %v937_v11 }
  0xf5   : > { %v939_v13 = vmul.f32 %v938_v12, %v938_v12 }
  0xf7   : > { %v940_v14 = vsel %vm926_vm1, %v939_v13, 0.0 }
  0xf8   : > { %941 = vadd.xlane.f32.xlu0 %v940_v14 }
 0x16b   : > { %v942_v26 = vpop.xlane.xlu0 %941 }
 0x16c   : > { %v943_v27 = vmul.f32 %v942_v26, %v2722_v9 }
 0x16e   : > { %v944_v29 = vadd.f32 1e-05, %v943_v27 }
 0x170   : > { %2019 = vrsqrt.f32 %v944_v29  ;;  %vm951_vm4 = vweird.f32 %v944_v29 }
 0x176   : > { %v2020_v30 = vpop.eup %2019 }
 0x177   : > { %v946_v31 = vmul.f32 %v2020_v30, %v944_v29  ;;  %vm952_vm3 = vweird.f32 %v2020_v30 }
 0x178   : > { %vm953_vm5 = vmor %vm951_vm4, %vm952_vm3 }
 0x179   : > { %v947_v32 = vmul.f32 %v2020_v30, %v946_v31 }
 0x17b   : > { %v948_v33 = vmul.f32 0.5, %v947_v32 }
 0x17d   : > { %v949_v34 = vsub.f32 1.5, %v948_v33 }
 0x17f   : > { %v950_v35 = vmul.f32 %v2020_v30, %v949_v34 }
 0x181   : > { %v954_v37 = vsel %vm953_vm5, %v2020_v30, %v950_v35 }
 0x182   : > { %v955_v38 = vmul.f32 %v954_v37, %v938_v12 }
 0x184   : > { %v959_v40 = vmul.f32 %v2007_v36, %v955_v38 }
 0x186   : > { %v963_v41 = vadd.f32 %v2008_v39, %v959_v40 }
 0x188   : > { %1848 = vmatmul.msk.f32.vlgmr.msra.gmra.mxu1 %vm926_vm1, %v963_v41  ;;  %1850 = vmatmul.msk.f32.vlgmr.msra.gmra.mxu2 %vm926_vm1, %v963_v41 }
 0x190   : > { %1849 = vmatmul.msk.f32.vlgmr.msrb.gmra.mxu1 %vm926_vm1, %v963_v41 }
 0x205   : > { %v992_v42 = vpop.f32.mrf.mxu1 }
 0x206   : > { %v993_v47 = vadd.f32 %v2009_v45, %v992_v42 }
 0x20b   : > { %v1048_v49 = vpop.f32.mrf.mxu2 }
 0x20c   : > { %v2767_v50 = vadd.f32 %v2010_v48, %v1048_v49 }
 0x20d   : > { %v1020_v44 = vpop.f32.mrf.mxu1 }
 0x20e   : > { %v1021_v46 = vadd.f32 %v2011_v43, %v1020_v44 }
 0x210   : > { %1063 = vrot.lane.b32.xlu0 %v1021_v46, %s2326_s17  ;;  %1061 = vrot.lane.b32.xlu2 %v1021_v46, %s2327_s20 }
 0x211   : > { %1059 = vrot.lane.b32.xlu1 %v1021_v46, %s2328_s7  ;;  %1851 = vmatpush.xpose.msk.msra.mxu3 %vm1075_vm6, %v1021_v46 }
 0x214   : > { %1852 = vmatmul.msk.f32.vlgmr.msra.gmra.mxu3 %vm1075_vm6, %v993_v47 }
 0x218   : > { %1054 = vrot.lane.b32.xlu2 %v993_v47, %s2327_s20 }
 0x219   : > { %1052 = vrot.lane.b32.xlu1 %v993_v47, %s2328_s7 }
 0x221   : > { %1056 = vrot.lane.b32.xlu1 %v993_v47, %s2326_s17 }
 0x26a   : > { %v1062_v51 = vpop.permute.xlu2 %1061 }
 0x26b   : > { %1855 = vmatpush.xpose.msk.msrb.mxu2 %vm1075_vm6, %v1062_v51 }
 0x26f   : > { %1249 = vmatpush.msra.mxu2 %v2767_v50 }
 0x272   : > { %v1055_v52 = vpop.permute.xlu2 %1054 }
 0x273   : > { %1856 = vmatmul.msk.f32.vlgmr.msrb.gmra.mxu2 %vm1075_vm6, %v1055_v52  ;;  %v1343_v52 = vld [vmem:[%s2682_s4 + $0x18] sm:$0xff] }
 0x274   : > { %1363 = vmatpush.msrb.mxu2 %v1343_v52  ;;  %v1492_v52 = vld [vmem:[%s2705_s23 + $0x30] sm:$0xff] }
 0x282   : > { %v1064_v53 = vpop.permute.xlu0 %1063 }
 0x283   : > { %v1060_v54 = vpop.permute.xlu1 %1059  ;;  %1857 = vmatpush.xpose.msk.msra.mxu1 %vm1075_vm6, %v1064_v53  ;;  %v1342_v53 = vld [vmem:[%s2682_s4 + $0x10] sm:$0xff] }
 0x284   : > { %1853 = vmatpush.xpose.msk.msrb.mxu3 %vm1075_vm6, %v1060_v54  ;;  %v1341_v54 = vld [vmem:[%s2682_s4 + $0x8] sm:$0xff]  ;;  %1364 = vmatpush.msrb.mxu2 %v1342_v53 }
 0x286   : > { %1365 = vmatpush.msrb.mxu2 %v1341_v54 }
 0x28b   : > { %v1053_v55 = vpop.permute.xlu1 %1052 }
 0x28c   : > { %1854 = vmatmul.msk.f32.vlgmr.msrb.gmra.mxu3 %vm1075_vm6, %v1053_v55  ;;  %v1340_v55 = vld [vmem:[%s2682_s4] sm:$0xff] }
 0x28d   : > { %1366 = vmatpush.msrb.mxu2 %v1340_v55  ;;  %v1491_v55 = vld [vmem:[%s2705_s23 + $0x28] sm:$0xff] }
 0x293   : > { %v1057_v56 = vpop.permute.xlu1 %1056 }
 0x294   : > { %1858 = vmatmul.msk.f32.vlgmr.msra.gmra.mxu1 %vm1075_vm6, %v1057_v56 }
 0x297   : > { %v1097_v0 = vpop.f32.mrf.mxu3 }
 0x298   : > { %v1172_v8 = vmul.f32 0.35355338, %v1097_v0 }
 0x29a   : > { %v1183_v12 = vsel %vm1180_vm7, -inf, %v1172_v8 }
 0x29b   : > { %v1187_v13 = vsel %vm1075_vm6, %v1183_v12, -inf }
 0x2f6   : > { %v1145_v60 = vpop.f32.mrf.mxu2 }
 0x2f7   : > { %v1174_v61 = vmul.f32 0.35355338, %v1145_v60 }
 0x2f9   : > { %v1185_v62 = vsel %vm1180_vm7, -inf, %v1174_v61 }
 0x2fa   : > { %v1193_v63 = vsel %vm1075_vm6, %v1185_v62, -inf }
 0x2fb   : > { %1194 = vmax.xlane.f32.xlu1 %v1193_v63  ;;  %v2012_v63 = vld [vmem:[%s896_s30] ss:$0 sm:$0xff]  ;;  %s3023_s30 = sld [smem:[#allocation45_spill]] }
 0x301   : > { %s3024_s1 = scalar_lea.vmem %s3023_s30, %s2653_s24 }
 0x30f   : > { %v1121_v2 = vpop.f32.mrf.mxu3 }
 0x310   : > { %v1173_v3 = vmul.f32 0.35355338, %v1121_v2 }
 0x311   : > { %v1169_v4 = vpop.f32.mrf.mxu1 }
 0x312   : > { %v1175_v5 = vmul.f32 0.35355338, %v1169_v4  ;;  %v1184_v6 = vsel %vm1180_vm7, -inf, %v1173_v3 }
 0x313   : > { %v1190_v7 = vsel %vm1075_vm6, %v1184_v6, -inf }
 0x314   : > { %1191 = vmax.xlane.f32.xlu2 %v1190_v7  ;;  %v1186_v10 = vsel %vm1180_vm7, -inf, %v1175_v5 }
 0x315   : > { %v1196_v11 = vsel %vm1075_vm6, %v1186_v10, -inf }
 0x316   : > { %1197 = vmax.xlane.f32.xlu0 %v1196_v11  ;;  %v1407_v11 = vld [vmem:[%s2695_s25 + $0x18] sm:$0xff] }
 0x31c   : > { %1188 = vmax.xlane.f32.xlu2 %v1187_v13  ;;  %v1405_v13 = vld [vmem:[%s2695_s25 + $0x8] sm:$0xff] }
 0x32a   : > { %1069 = vrot.lane.b32.xlu0 %v2767_v50, %s2327_s20 }
 0x36e   : > { %v1195_v14 = vpop.xlane.xlu1 %1194 }
 0x36f   : > { %v1201_v15 = vsub.f32 %v1185_v62, %v1195_v14 }
 0x371   : > { %v1207_v16 = vmul.f32 1.442695, %v1201_v15 }
 0x373   : > { %2021 = vpow2.f32 %v1207_v16 }
 0x379   : > { %v2022_v17 = vpop.eup %2021 }
 0x37a   : > { %v1217_v18 = vsel %vm1075_vm6, %v2022_v17, 0.0 }
 0x37b   : > { %1218 = vadd.xlane.f32.xlu1 %v1217_v18 }
 0x387   : > { %v1192_v19 = vpop.xlane.xlu2 %1191 }
 0x388   : > { %v1200_v22 = vsub.f32 %v1184_v6, %v1192_v19 }
 0x389   : > { %v1198_v20 = vpop.xlane.xlu0 %1197 }
 0x38a   : > { %v1202_v21 = vsub.f32 %v1186_v10, %v1198_v20  ;;  %v1205_v24 = vmul.f32 1.442695, %v1200_v22 }
 0x38c   : > { %v1209_v23 = vmul.f32 1.442695, %v1202_v21 }
 0x38e   : > { %2023 = vpow2.f32 %v1209_v23  ;;  %v2013_v23 = vld [vmem:[%s752_s18] ss:$0 sm:$0xff] }
 0x38f   : > { %v1189_v25 = vpop.xlane.xlu2 %1188  ;;  %2025 = vpow2.f32 %v1205_v24 }
 0x390   : > { %v1199_v26 = vsub.f32 %v1183_v12, %v1189_v25  ;;  %v1406_v12 = vld [vmem:[%s2695_s25 + $0x10] sm:$0xff] }
 0x392   : > { %v1203_v27 = vmul.f32 1.442695, %v1199_v26 }
 0x394   : > { %v2024_v28 = vpop.eup %2023  ;;  %2027 = vpow2.f32 %v1203_v27  ;;  %1066 = vrot.lane.b32.xlu1 %v2767_v50, %s2328_s7 }
 0x395   : > { %v1220_v29 = vsel %vm1075_vm6, %v2024_v28, 0.0  ;;  %v2026_v30 = vpop.eup %2025 }
 0x396   : > { %1221 = vadd.xlane.f32.xlu2 %v1220_v29  ;;  %v1214_v34 = vsel %vm1075_vm6, %v2026_v30, 0.0 }
 0x39a   : > { %v2028_v31 = vpop.eup %2027 }
 0x39b   : > { %v1211_v32 = vsel %vm1075_vm6, %v2028_v31, 0.0 }
 0x39c   : > { %v1070_v33 = vpop.permute.xlu0 %1069  ;;  %1212 = vadd.xlane.f32.xlu0 %v1211_v32  ;;  %v1501_v32 = vld [vmem:[%s2705_s23 + $0x78] sm:$0xff] }
 0x39d   : > { %1295 = vmatpush.msra.mxu0 %v1070_v33 }
 0x39e   : > { %1215 = vadd.xlane.f32.xlu2 %v1214_v34  ;;  %v1500_v34 = vld [vmem:[%s2705_s23 + $0x70] sm:$0xff] }
 0x39f   : > { %1506 = vmatpush.msrb.mxu0 %v1501_v32 }
 0x3a1   : > { %1507 = vmatpush.msrb.mxu0 %v1500_v34 }
 0x3b6   : > { %1072 = vrot.lane.b32.xlu2 %v2767_v50, %s2326_s17 }
 0x3ee   : > { %v1219_v35 = vpop.xlane.xlu1 %1218 }
 0x3ef   : > { %2029 = vrcp.f32 %v1219_v35  ;;  %v1499_v35 = vld [vmem:[%s2705_s23 + $0x68] sm:$0xff] }
 0x3f0   : > { %1508 = vmatpush.msrb.mxu0 %v1499_v35 }
 0x3f5   : > { %v2030_v36 = vpop.eup %2029 }
 0x3f6   : > { %v1229_v37 = vmul.f32 %v2030_v36, %v2022_v17 }
 0x3f8   : > { %1861 = vmatmul.msk.f32.vlgmr.msra.gmra.mxu0 %vm1075_vm6, %v1229_v37  ;;  %v2015_v37 = vld [vmem:[%s907_s14] ss:$0 sm:$0xff] }
 0x406   : > { %v1067_v38 = vpop.permute.xlu1 %1066 }
 0x407   : > { %1272 = vmatpush.msra.mxu3 %v1067_v38  ;;  %v1498_v38 = vld [vmem:[%s2705_s23 + $0x60] sm:$0xff] }
 0x408   : > { %1509 = vmatpush.msrb.mxu0 %v1498_v38 }
 0x409   : > { %v1222_v39 = vpop.xlane.xlu2 %1221  ;;  %1427 = vmatpush.msrb.mxu3 %v1407_v11 }
 0x40a   : > { %2031 = vrcp.f32 %v1222_v39  ;;  %v1497_v39 = vld [vmem:[%s2705_s23 + $0x58] sm:$0xff] }
 0x40b   : > { %1428 = vmatpush.msrb.mxu3 %v1406_v12  ;;  %1510 = vmatpush.msrb.mxu0 %v1497_v39 }
 0x40d   : > { %1429 = vmatpush.msrb.mxu3 %v1405_v13 }
 0x40f   : > { %v1213_v40 = vpop.xlane.xlu0 %1212 }
 0x410   : > { %2033 = vrcp.f32 %v1213_v40  ;;  %v2032_v42 = vpop.eup %2031 }
 0x411   : > { %v1216_v41 = vpop.xlane.xlu2 %1215  ;;  %v1230_v46 = vmul.f32 %v2032_v42, %v2024_v28  ;;  %v2332_v28 = vmov 1.4142135  }
 0x412   : > { %2035 = vrcp.f32 %v1216_v41 }
 0x416   : > { %v2034_v43 = vpop.eup %2033 }
 0x417   : > { %v1227_v44 = vmul.f32 %v2034_v43, %v2028_v31  ;;  %v1496_v43 = vld [vmem:[%s2705_s23 + $0x50] sm:$0xff] }
 0x418   : > { %v2036_v45 = vpop.eup %2035  ;;  %1511 = vmatpush.msrb.mxu0 %v1496_v43 }
 0x419   : > { %v1228_v47 = vmul.f32 %v2036_v45, %v2026_v30  ;;  %1859 = vmatmul.msk.f32.vlgmr.msra.gmra.mxu2 %vm1075_vm6, %v1227_v44  ;;  %v1073_v48 = vpop.permute.xlu2 %1072  ;;  %v1495_v45 = vld [vmem:[%s2705_s23 + $0x48] sm:$0xff] }
 0x41a   : > { %1318 = vmatpush.msrb.mxu1 %v1073_v48  ;;  %1512 = vmatpush.msrb.mxu0 %v1495_v45 }
 0x41b   : > { %1860 = vmatmul.msk.f32.vlgmr.msra.gmra.mxu3 %vm1075_vm6, %v1228_v47  ;;  %1862 = vmatmul.msk.f32.vlgmr.msrb.gmra.mxu1 %vm1075_vm6, %v1230_v46  ;;  %v1494_v47 = vld [vmem:[%s2705_s23 + $0x40] sm:$0xff] }
 0x41c   : > { %1513 = vmatpush.msrb.mxu0 %v1494_v47 }
 0x475   : > { %v1297_v49 = vpop.f32.mrf.mxu0 }
 0x476   : > { %1328 = vrot.lane.b32.xlu2 %v1297_v49, %s2329_s13  ;;  %v1493_v49 = vld [vmem:[%s2705_s23 + $0x38] sm:$0xff] }
 0x477   : > { %1514 = vmatpush.msrb.mxu0 %v1493_v49 }
 0x479   : > { %1515 = vmatpush.msrb.mxu0 %v1492_v52 }
 0x47b   : > { %1516 = vmatpush.msrb.mxu0 %v1491_v55 }
 0x498   : > { %v1320_v51 = vpop.f32.mrf.mxu1 }
 0x49c   : > { %v1251_v57 = vpop.f32.mrf.mxu2 }
 0x49e   : > { %v1274_v50 = vpop.f32.mrf.mxu3 }
 0x49f   : > { %1324 = vrot.lane.b32.xlu1 %v1274_v50, %s2330_s21 }
 0x4a7   : > { %1332 = vrot.lane.b32.xlu1 %v1320_v51, %s2331_s11 }
 0x4d0   : > { %v1329_v59 = vpop.permute.xlu2 %1328 }
 0x511   : > { %v1325_v56 = vpop.permute.xlu1 %1324 }
 0x512   : > { %v1335_v58 = vsel %vm1075_vm6, %v1251_v57, %v1325_v56 }
 0x513   : > { %v1337_v61 = vsel %vm1336_vm8, %v1335_v58, %v1329_v59  ;;  %v1490_v58 = vld [vmem:[%s2705_s23 + $0x20] sm:$0xff]  ;;  %v1489_v59 = vld [vmem:[%s2705_s23 + $0x18] sm:$0xff] }
 0x514   : > { %1517 = vmatpush.msrb.mxu0 %v1490_v58 }
 0x516   : > { %1518 = vmatpush.msrb.mxu0 %v1489_v59 }
 0x519   : > { %v1333_v60 = vpop.permute.xlu1 %1332 }
 0x51a   : > { %v1339_v62 = vsel %vm1338_vm9, %v1337_v61, %v1333_v60  ;;  %v1488_v61 = vld [vmem:[%s2705_s23 + $0x10] sm:$0xff] }
 0x51b   : > { %1863 = vmatmul.msk.f32.vlgmr.msrb.gmra.mxu2 %vm926_vm1, %v1339_v62  ;;  %1519 = vmatpush.msrb.mxu0 %v1488_v61 }
 0x59e   : > { %v1368_v0 = vpop.f32.mrf.mxu2 }
 0x59f   : > { %v1369_v2 = vadd.f32 %v2012_v63, %v1368_v0  ;;  %v1487_v0 = vld [vmem:[%s2705_s23 + $0x8] sm:$0xff] }
 0x5a0   : > { %1520 = vmatpush.msrb.mxu0 %v1487_v0 }
 0x5a1   : > { %v2810_v3 = vadd.f32 %v1369_v2, %v2718_v1  ;;  %v1404_v1 = vld [vmem:[%s2695_s25] sm:$0xff] }
 0x5a2   : > { %1430 = vmatpush.msrb.mxu3 %v1404_v1 }
 0x5a3   : > { %v1374_v4 = vsel %vm926_vm1, %v2810_v3, 0.0 }
 0x5a4   : > { %1375 = vadd.xlane.f32.xlu2 %v1374_v4  ;;  %v1486_v4 = vld [vmem:[%s2705_s23] sm:$0xff] }
 0x5a5   : > { %1521 = vmatpush.msrb.mxu0 %v1486_v4 }
 0x617   : > { %v1376_v5 = vpop.xlane.xlu2 %1375 }
 0x618   : > { %v1377_v6 = vmul.f32 %v1376_v5, %v2722_v9 }
 0x61a   : > { %v1378_v7 = vsub.f32 %v2810_v3, %v1377_v6 }
 0x61c   : > { %v1379_v8 = vmul.f32 %v1378_v7, %v1378_v7 }
 0x61e   : > { %v1380_v10 = vsel %vm926_vm1, %v1379_v8, 0.0 }
 0x61f   : > { %1381 = vadd.xlane.f32.xlu1 %v1380_v10 }
 0x692   : > { %v1382_v14 = vpop.xlane.xlu1 %1381 }
 0x693   : > { %v1383_v15 = vmul.f32 %v1382_v14, %v2722_v9  ;;  %v2014_v9 = vld [vmem:[%s3024_s1] ss:$0 sm:$0xff] }
 0x695   : > { %v1384_v16 = vadd.f32 1e-05, %v1383_v15 }
 0x697   : > { %2037 = vrsqrt.f32 %v1384_v16  ;;  %vm1391_vm11 = vweird.f32 %v1384_v16 }
 0x698   : > { %2039 = vrcp.f32 %v2332_v28 }
 0x69d   : > { %v2038_v17 = vpop.eup %2037 }
 0x69e   : > { %v1386_v18 = vmul.f32 %v2038_v17, %v1384_v16  ;;  %vm1392_vm10 = vweird.f32 %v2038_v17  ;;  %v2040_v29 = vpop.eup %2039 }
 0x69f   : > { %vm1393_vm12 = vmor %vm1391_vm11, %vm1392_vm10  ;;  %v1437_v30 = vmul.f32 1.4142135, %v2040_v29  ;;  %vm1441_vm13 = vweird.f32 %v2040_v29 }
 0x6a0   : > { %v1387_v19 = vmul.f32 %v2038_v17, %v1386_v18 }
 0x6a1   : > { %v1438_v31 = vsub.f32 1.0, %v1437_v30  ;;  %v2016_v30 = vld [vmem:[%s915_s12] ss:$0 sm:$0xff] }
 0x6a2   : > { %v1388_v20 = vmul.f32 0.5, %v1387_v19 }
 0x6a3   : > { %v1439_v33 = vmul.f32 %v2040_v29, %v1438_v31 }
 0x6a4   : > { %v1389_v21 = vsub.f32 1.5, %v1388_v20 }
 0x6a5   : > { %v1440_v36 = vadd.f32 %v2040_v29, %v1439_v33 }
 0x6a6   : > { %v1390_v22 = vmul.f32 %v2038_v17, %v1389_v21 }
 0x6a7   : > { %v1442_v41 = vsel %vm1441_vm13, %v2040_v29, %v1440_v36 }
 0x6a8   : > { %v1394_v24 = vsel %vm1393_vm12, %v2038_v17, %v1390_v22 }
 0x6a9   : > { %v1395_v25 = vmul.f32 %v1394_v24, %v1378_v7 }
 0x6ab   : > { %v1399_v26 = vmul.f32 %v2013_v23, %v1395_v25 }
 0x6ad   : > { %v1403_v27 = vadd.f32 %v2014_v9, %v1399_v26 }
 0x6af   : > { %1864 = vmatmul.msk.f32.vlgmr.msrb.gmra.mxu3 %vm926_vm1, %v1403_v27 }
 0x732   : > { %v1432_v40 = vpop.f32.mrf.mxu3 }
 0x733   : > { %v2840_v42 = vadd.f32 %v2015_v37, %v1432_v40 }
 0x735   : > { %v1443_v44 = vmul.f32 %v1442_v41, %v2840_v42  ;;  %v1435_v27 = vmul.f32 0.5, %v2840_v42 }
 0x737   : > { %v1444_v46 = vmul.f32 %v1443_v44, %v1443_v44 }
 0x739   : > { %v1445_v48 = vmin.f32 %v1444_v46, 16.0 }
 0x73b   : > { %v1446_v50 = vmul.f32 2.1237322e-06, %v1445_v48  ;;  %v1457_v51 = vmul.f32 3.8918573e-05, %v1445_v48 }
 0x73d   : > { %v1447_v53 = vadd.f32 0.00028619796, %v1446_v50  ;;  %v1458_v54 = vadd.f32 0.001143296, %v1457_v51 }
 0x73f   : > { %v1448_v56 = vmul.f32 %v1447_v53, %v1445_v48  ;;  %v1459_v57 = vmul.f32 %v1458_v54, %v1445_v48 }
 0x741   : > { %v1460_v60 = vadd.f32 0.014752088, %v1459_v57  ;;  %v1449_v62 = vadd.f32 0.0036580483, %v1448_v56 }
 0x743   : > { %v1461_v63 = vmul.f32 %v1460_v60, %v1445_v48  ;;  %v1450_v5 = vmul.f32 %v1449_v62, %v1445_v48 }
 0x745   : > { %v1462_v2 = vadd.f32 0.112945676, %v1461_v63  ;;  %v1451_v8 = vadd.f32 0.05243302, %v1450_v5 }
 0x747   : > { %v1463_v6 = vmul.f32 %v1462_v2, %v1445_v48  ;;  %v1452_v12 = vmul.f32 %v1451_v8, %v1445_v48 }
 0x749   : > { %v1464_v7 = vadd.f32 0.4994258, %v1463_v6  ;;  %v1453_v13 = vadd.f32 0.18741608, %v1452_v12 }
 0x74b   : > { %v1465_v10 = vmul.f32 %v1464_v7, %v1445_v48  ;;  %v1454_v14 = vmul.f32 %v1453_v13, %v1445_v48 }
 0x74d   : > { %v1466_v11 = vadd.f32 1.0, %v1465_v10  ;;  %v1455_v18 = vadd.f32 1.1283791, %v1454_v14 }
 0x74f   : > { %2041 = vrcp.f32 %v1466_v11  ;;  %v1478_v17 = vand.u32 2147483648, %v1466_v11  ;;  %v1476_v20 = vand.u32 2147483647, %v1466_v11  ;;  %vm1472_vm15 = vweird.f32 %v1466_v11 }
 0x750   : > { %v1456_v23 = vmul.f32 %v1455_v18, %v1443_v44 }
 0x751   : > { %v1479_v22 = vor.u32 1.1754944e-38, %v1478_v17  ;;  %vm1477_vm2 = vcmp.eq.f32.partialorder %v1476_v20, 8.507059e+37 }
 0x755   : > { %v2042_v1 = vpop.eup %2041 }
 0x756   : > { %v1468_v15 = vmul.f32 %v2042_v1, %v1466_v11  ;;  %vm1473_vm14 = vweird.f32 %v2042_v1 }
 0x757   : > { %vm1474_vm0 = vmor %vm1472_vm15, %vm1473_vm14 }
 0x758   : > { %v1469_v16 = vsub.f32 1.0, %v1468_v15 }
 0x75a   : > { %v1470_v19 = vmul.f32 %v2042_v1, %v1469_v16 }
 0x75c   : > { %v1471_v21 = vadd.f32 %v2042_v1, %v1470_v19 }
 0x75e   : > { %v1475_v24 = vsel %vm1474_vm0, %v2042_v1, %v1471_v21 }
 0x75f   : > { %v1480_v25 = vsel %vm1477_vm2, %v1479_v22, %v1475_v24 }
 0x760   : > { %v1481_v9 = vmul.f32 %v1480_v25, %v1456_v23 }
 0x762   : > { %v1865_v26 = vclamps-f32 %v1481_v9, 1.0 }
 0x764   : > { %v1484_v28 = vadd.f32 1.0, %v1865_v26 }
 0x766   : > { %v1485_v29 = vmul.f32 %v1484_v28, %v1435_v27 }
 0x768   : > { %1522 = vmatmul.f32.vlgmr.msrb.gmra.mxu0 %v1485_v29 }
 0x7e5   : > { %v1523_v31 = vpop.f32.mrf.mxu0 }
 0x7e6   : > { %v1524_v32 = vadd.f32 %v2016_v30, %v1523_v31  ;;  %1531 = sbr.rel (%p1866_p10) target bundleno = 2028 (0x7ec), region = 116 }
 0x7e8   : > { %v1526_v33 = vadd.f32 %v1524_v32, %v2810_v3 }
 0x7ea   : > { %1527 = vst.msk [vmem:[#allocation2] sm:$0xff] %vm926_vm1, %v1526_v33 }
 0x7eb   : > { %1532 = vst.msk [vmem:[%s2714_s28] sm:$0xff] %vm926_vm1, %v1526_v33 }
 0x7ec PF: > { %s3028_s22 = sld [smem:[#allocation23_spill]]  ;;  %s1546_s7 = sshll.u32 %s2714_s28, 4  ;;  %s1547_s7 = int_to_ptr.vmem [resolvable:$true] %s1546_s7 }
 0x7ed   : > { %s3030_s17 = sld [smem:[#allocation50_spill]]  ;;  %s1534_s2 = scalar_lea.sflag [#allocation5], %s2624_s6 }
 0x7f2   : > { %s1868_s27 = sshll.u32 %s3028_s22, 3 }
 0x7f3   : > { %s1544_s20 = scalar_lea.hbm %s3030_s17, %s1868_s27  ;;  %s2213_s11 = scalar_lea.hbm %s3030_s17, 16 }
 0x7f4   : > { %s1548_s26 = sshll.u32 %s1544_s20, 4  ;;  %s1549_s26 = int_to_ptr.hbm [resolvable:$true] %s1548_s26 }
 0x7f5   : > { %s2207_s10 = sshra.s32 %s1549_s26, 4  ;;  %s2208_s10 = int_to_ptr.hbm [resolvable:$true] %s2207_s10 }
 0x7f6   : > { %s2209_s3 = scalar_lea.hbm %s2208_s10, 8  ;;  %p2214_p6 = scmp.lt.s32.totalorder %s2208_s10, %s3030_s17 }
 0x7f7   : > { %p2210_p12 = scmp.ne.s32.totalorder %s2208_s10, %s2209_s3  ;;  %p2215_p8 = scmp.lt.s32.totalorder %s2213_s11, %s2209_s3 }
 0x7f9   : > { %p2211_p2 = pnand %p2210_p12, %p2582_p0  ;;  %p2216_p1 = por %p2215_p8, %p2214_p6 }
 0x7fb   : > { %p2212_p4 = pneg %p2211_p2 }
 0x7fd   : > { %p2217_p9 = pnand %p2216_p1, %p2212_p4 }
 0x7ff   : > { %2220 = shalt.err (!%p2217_p9)
}
 0x800   : > { %1887 = dma.vmem_to_hbm [thread:$0]  (%p2582_p0), %s1547_s7, 128, %s1549_s26, %s1534_s2  }
 0x801 PF: > { %s3031_s28 = sld [smem:[#allocation26_spill]] }
 0x802   : > { %s3032_s6 = sld [smem:[#allocation19_spill]] }
 0x807   : > { %p1910_p13 = scmp.ge.s32.totalorder %s3031_s28, 2 }
 0x808   : > { %s1560_s25 = sand.u32 1, %s3032_s6  }
 0x809   : > { %p1906_p11 = pnand %p1910_p13, %p2594_p3  ;;  %s1561_s4 = scalar_lea.sflag [#allocation5], %s1560_s25 }
 0x80b   : > { %p1907_p5 = pneg %p1906_p11 }
 0x80d   : > { %2278 = dma.done.wait (%p1907_p5), %s1561_s4, 128  }
 0x80e   : > { %2280 = vsyncadd (%p1907_p5), %s1561_s4, 4294967168  ;;  %s39_s1 = sadd.s32 1, %s3031_s28   ;;  %s3034_s24 = sld [smem:[#allocation17_spill]] }
 0x80f   : > { %p36_p7 = scmp.ge.s32.totalorder %s39_s1, 6   ;;  %s3035_s25 = sld [smem:[#allocation18_spill]] }
 0x810   : > { %s3036_s26 = sld [smem:[#allocation28_spill]] }
 0x811   : > { %s3037_s27 = sld [smem:[#allocation20_spill]] }
 0x812   : > { %s3038_s28 = sld [smem:[#allocation21_spill]] }
 0x813   : > { %s3039_s29 = sld [smem:[#allocation31_spill]]  ;;  %38 = sbr.rel (!%p36_p7) target bundleno = 32 (0x20), region = 225 }
 0x814   : > { %s3040_s0 = sld [smem:[#allocation24_spill]] }
 0x815   : > { %s3041_s30 = sld [smem:[#allocation25_spill]] }
 0x816   : > { %s3042_s18 = sld [smem:[#allocation27_spill]] }
 0x817   : > { %s3043_s19 = sld [smem:[#allocation29_spill]] }
 0x818   :  { %1567 = vsyncpa [#allocation4], 1 }
 0x819   :  { %1569 = vsyncpa [#allocation4 + $0x1], 1 }
 0x81a   :  { %1570 = vsyncpa [#allocation7], 1 }
 0x81b   :  { %1572 = vsyncpa [#allocation7 + $0x1], 1 }
 0x81c   :  { %1573 = vsyncpa [#allocation10], 1 }
 0x81d   :  { %1575 = vsyncpa [#allocation10 + $0x1], 1 }
 0x81e   :  { %1576 = vsyncpa [#allocation5], 1 }
 0x81f   :  { %1578 = vsyncpa [#allocation5 + $0x1], 1 }

</bundles_post_ra>
